<compile_context>
chip_gen: v5e
topology: v5e:2x2
jax: 0.10.0
libtpu: 0.0.40
codegen_flags: <defaults>
</compile_context>

<pallas_src>
import jax
import jax.numpy as jnp
from jax import lax
from jax.experimental import pallas as pl
from jax.experimental.pallas import tpu as pltpu


def _round_up(x, m):
    return ((x + m - 1) // m) * m


# ----------------------------------------------------------------------------
# Pallas kernel: full LSTM recurrence + selection of the hidden state at
# position lengths[i]-1 (reproduces the one-hot-mask torch.bmm in Encoder).
# ----------------------------------------------------------------------------
def lstm_encoder_kernel(x_ref, wih_ref, whh_ref, b_ref, len_ref, out_ref,
                        h_sc, c_sc, gx_sc):
    # x_ref:   [T*N, E]   bf16  time-major flattened embedded tokens
    # wih_ref: [E, 4*Hp]  bf16  input->gate weights (each gate padded H->Hp)
    # whh_ref: [Hp, 4*Hp] f32   hidden->gate weights (padded)
    # b_ref:   [1, 4*Hp]  f32   b_ih + b_hh (padded)
    # len_ref: [N, 1]     int32 sequence lengths (assumed in [1, T])
    # out_ref: [N, Hp]    f32   hidden state at t == length-1
    # h_sc/c_sc: [N, Hp] f32 scratch; gx_sc: [T, N, 4*Hp] f32 scratch
    T, N, G = gx_sc.shape
    Hp = h_sc.shape[1]

    # ---- Hoisted input projection: one big MXU call for all timesteps. ----
    gx = jnp.dot(x_ref[...], wih_ref[...], preferred_element_type=jnp.float32)
    gx_sc[...] = (gx + b_ref[...]).reshape(T, N, G)

    h_sc[...] = jnp.zeros_like(h_sc)
    c_sc[...] = jnp.zeros_like(c_sc)
    out_ref[...] = jnp.zeros_like(out_ref)

    def step(t, carry):
        # Only the recurrent matmul stays on the serial critical path.
        gates = gx_sc[t] + jnp.dot(h_sc[...], whh_ref[...],
                                   preferred_element_type=jnp.float32)
        # Lane-aligned (128-multiple) gate slices; PyTorch gate order i, f, g, o.
        i_g = jax.nn.sigmoid(gates[:, 0 * Hp:1 * Hp])
        f_g = jax.nn.sigmoid(gates[:, 1 * Hp:2 * Hp])
        g_g = jnp.tanh(gates[:, 2 * Hp:3 * Hp])
        o_g = jax.nn.sigmoid(gates[:, 3 * Hp:4 * Hp])
        c = f_g * c_sc[...] + i_g * g_g
        h = o_g * jnp.tanh(c)
        c_sc[...] = c
        h_sc[...] = h
        # One-hot-mask selection (same math as torch.bmm(mask, states)).
        sel = (len_ref[...] - 1) == t                    # [N, 1] bool
        out_ref[...] = jnp.where(sel, h, out_ref[...])
        return carry

    lax.fori_loop(0, T, step, 0, unroll=True)


# ----------------------------------------------------------------------------
# Weight padding: each gate block is widened from H to Hp with zeros.  Padded
# hidden units stay exactly zero through the recurrence (gates_pad == 0 =>
# c_pad stays 0, h_pad stays 0), so the math on the first H units is unchanged.
# ----------------------------------------------------------------------------
def _pad_lstm_weights(wih, whh, bias, H, Hp):
    def pad_gate_cols(w):
        parts = jnp.split(w, 4, axis=-1)
        parts = [jnp.pad(p, ((0, 0), (0, Hp - H))) for p in parts]
        return jnp.concatenate(parts, axis=-1)

    wih_p = pad_gate_cols(wih)                                   # [E, 4Hp]
    whh_p = pad_gate_cols(jnp.pad(whh, ((0, Hp - H), (0, 0))))   # [Hp, 4Hp]
    b_p = pad_gate_cols(bias)                                    # [1, 4Hp]
    return wih_p, whh_p, b_p


# ----------------------------------------------------------------------------
# Encoder.forward
# ----------------------------------------------------------------------------
def encoder_forward(embed, wih, whh, bias, input_ids, lengths):
    """input_ids: [N, T] int32, lengths: [N] int32 -> states [N, H] f32."""
    N, T = input_ids.shape
    H = whh.shape[0]
    Hp = _round_up(max(H, 128), 128)

    # Embedding lookup (glue) + time-major layout, bf16 operands for the
    # hoisted input projection (f32 accumulation happens inside the kernel).
    # TODO(synk): the gather itself stays in XLA; no clean in-kernel equivalent.
    x_emb = jnp.take(embed, input_ids, axis=0)                   # [N, T, E]
    x_tm = jnp.transpose(x_emb, (1, 0, 2))                       # [T, N, E]
    x_flat = x_tm.reshape(T * N, -1).astype(jnp.bfloat16)        # [T*N, E]

    wih_p, whh_p, b_p = _pad_lstm_weights(wih, whh, bias, H, Hp)
    wih_p = wih_p.astype(jnp.bfloat16)
    len2d = lengths.reshape(N, 1).astype(jnp.int32)

    vmem = lambda: pl.BlockSpec(memory_space=pltpu.MemorySpace.VMEM)
    out = pl.pallas_call(
        lstm_encoder_kernel,
        out_shape=jax.ShapeDtypeStruct((N, Hp), jnp.float32),
        in_specs=[vmem(), vmem(), vmem(), vmem(), vmem()],
        out_specs=vmem(),
        scratch_shapes=[pltpu.VMEM((N, Hp), jnp.float32),        # h
                        pltpu.VMEM((N, Hp), jnp.float32),        # c
                        pltpu.VMEM((T, N, 4 * Hp), jnp.float32)],  # x-gates
    )(x_flat, wih_p, whh_p, b_p, len2d)

    # Drop lane padding (equivalent of states.squeeze() -> [N, H]).
    return out[:, :H]


if __name__ == "__main__":
    vocab_size, embed_size, hidden_size = 20, 16, 32
    total_sentences, max_length = 8, 6

    key = jax.random.PRNGKey(0)
    k_emb, k_wih, k_whh, k_bih, k_bhh, k_ids = jax.random.split(key, 6)

    bound = 1.0 / float(jnp.sqrt(jnp.float32(hidden_size)))
    embed = jax.random.normal(k_emb, (vocab_size, embed_size), jnp.float32)
    wih = jax.random.uniform(k_wih, (embed_size, 4 * hidden_size),
                             jnp.float32, -bound, bound)
    whh = jax.random.uniform(k_whh, (hidden_size, 4 * hidden_size),
                             jnp.float32, -bound, bound)
    b_ih = jax.random.uniform(k_bih, (4 * hidden_size,), jnp.float32,
                              -bound, bound)
    b_hh = jax.random.uniform(k_bhh, (4 * hidden_size,), jnp.float32,
                              -bound, bound)
    bias = (b_ih + b_hh).reshape(1, 4 * hidden_size)

    input_ids = jax.random.randint(k_ids, (total_sentences, max_length), 0,
                                   vocab_size, dtype=jnp.int32)
    # NOTE: lengths are assumed to lie in [1, max_length], matching the
    # one-hot mask construction in the PyTorch Encoder.
    lengths = jnp.array([3, 6, 4, 5, 6, 2, 3, 4], dtype=jnp.int32)

    states = jax.jit(encoder_forward)(embed, wih, whh, bias, input_ids,
                                      lengths)
    states = jax.block_until_ready(states)
    assert states.shape == (total_sentences, hidden_size)
    assert states.dtype == jnp.float32
    print("KERNEL_OK")
</pallas_src>

<mosaic_0001>
module attributes {stable_mosaic.version = 11 : i64} {
  func.func @lstm_encoder_kernel(%arg0: memref<48x16xbf16, #tpu.memory_space<vmem>>, %arg1: memref<16x512xbf16, #tpu.memory_space<vmem>>, %arg2: memref<128x512xf32, #tpu.memory_space<vmem>>, %arg3: memref<1x512xf32, #tpu.memory_space<vmem>>, %arg4: memref<8x1xi32, #tpu.memory_space<vmem>>, %arg5: memref<8x128xf32, #tpu.memory_space<vmem>>, %arg6: memref<8x128xf32, #tpu.memory_space<vmem>>, %arg7: memref<8x128xf32, #tpu.memory_space<vmem>>, %arg8: memref<6x8x512xf32, #tpu.memory_space<vmem>>) attributes {dimension_semantics = [], scalar_prefetch = 0 : i64, scratch_operands = 3 : i64, tpu.core_type = #tpu.core_type<tc>} {
    %c0 = arith.constant 0 : index
    %c0_0 = arith.constant 0 : index
    %0 = vector.load %arg0[%c0, %c0_0] : memref<48x16xbf16, #tpu.memory_space<vmem>>, vector<48x16xbf16>
    %c0_1 = arith.constant 0 : index
    %c0_2 = arith.constant 0 : index
    %1 = vector.load %arg1[%c0_1, %c0_2] : memref<16x512xbf16, #tpu.memory_space<vmem>>, vector<16x512xbf16>
    %cst = arith.constant dense<0.000000e+00> : vector<48x512xf32>
    %2 = tpu.matmul %0, %1, %cst {dimension_numbers = #tpu.dot_dimension_numbers<[1], [0], [0], [1], [0, 0, 1, 1], [], []>} : vector<48x16xbf16>, vector<16x512xbf16>, vector<48x512xf32> -> vector<48x512xf32>
    %c0_3 = arith.constant 0 : index
    %c0_4 = arith.constant 0 : index
    %3 = vector.load %arg3[%c0_3, %c0_4] : memref<1x512xf32, #tpu.memory_space<vmem>>, vector<1x512xf32>
    %4 = vector.broadcast %3 : vector<1x512xf32> to vector<48x512xf32>
    %5 = arith.addf %2, %4 : vector<48x512xf32>
    %6 = vector.shape_cast %5 : vector<48x512xf32> to vector<6x8x512xf32>
    %c0_5 = arith.constant 0 : index
    %c0_6 = arith.constant 0 : index
    %c0_7 = arith.constant 0 : index
    %7 = vector.load %arg8[%c0_5, %c0_6, %c0_7] : memref<6x8x512xf32, #tpu.memory_space<vmem>>, vector<6x8x512xf32>
    tpu.vector_store %arg8[%c0_5, %c0_6, %c0_7], %6 {strides = array<i32>} : memref<6x8x512xf32, #tpu.memory_space<vmem>>, vector<6x8x512xf32>,
    %cst_8 = arith.constant 0.000000e+00 : f32
    %8 = vector.broadcast %cst_8 : f32 to vector<8x128xf32>
    %c0_9 = arith.constant 0 : index
    %c0_10 = arith.constant 0 : index
    %9 = vector.load %arg6[%c0_9, %c0_10] : memref<8x128xf32, #tpu.memory_space<vmem>>, vector<8x128xf32>
    tpu.vector_store %arg6[%c0_9, %c0_10], %8 {strides = array<i32>} : memref<8x128xf32, #tpu.memory_space<vmem>>, vector<8x128xf32>,
    %cst_11 = arith.constant 0.000000e+00 : f32
    %10 = vector.broadcast %cst_11 : f32 to vector<8x128xf32>
    %c0_12 = arith.constant 0 : index
    %c0_13 = arith.constant 0 : index
    %11 = vector.load %arg7[%c0_12, %c0_13] : memref<8x128xf32, #tpu.memory_space<vmem>>, vector<8x128xf32>
    tpu.vector_store %arg7[%c0_12, %c0_13], %10 {strides = array<i32>} : memref<8x128xf32, #tpu.memory_space<vmem>>, vector<8x128xf32>,
    %cst_14 = arith.constant 0.000000e+00 : f32
    %12 = vector.broadcast %cst_14 : f32 to vector<8x128xf32>
    %c0_15 = arith.constant 0 : index
    %c0_16 = arith.constant 0 : index
    %13 = vector.load %arg5[%c0_15, %c0_16] : memref<8x128xf32, #tpu.memory_space<vmem>>, vector<8x128xf32>
    tpu.vector_store %arg5[%c0_15, %c0_16], %12 {strides = array<i32>} : memref<8x128xf32, #tpu.memory_space<vmem>>, vector<8x128xf32>,
    %c0_i32 = arith.constant 0 : i32
    %14 = arith.index_cast %c0_i32 : i32 to index
    %c0_17 = arith.constant 0 : index
    %c0_18 = arith.constant 0 : index
    %15 = vector.load %arg8[%14, %c0_17, %c0_18] : memref<6x8x512xf32, #tpu.memory_space<vmem>>, vector<1x8x512xf32>
    %16 = vector.shape_cast %15 : vector<1x8x512xf32> to vector<8x512xf32>
    %c0_19 = arith.constant 0 : index
    %c0_20 = arith.constant 0 : index
    %17 = vector.load %arg6[%c0_19, %c0_20] : memref<8x128xf32, #tpu.memory_space<vmem>>, vector<8x128xf32>
    %c0_21 = arith.constant 0 : index
    %c0_22 = arith.constant 0 : index
    %18 = vector.load %arg2[%c0_21, %c0_22] : memref<128x512xf32, #tpu.memory_space<vmem>>, vector<128x512xf32>
    %cst_23 = arith.constant dense<0.000000e+00> : vector<8x512xf32>
    %19 = tpu.matmul %17, %18, %cst_23 {dimension_numbers = #tpu.dot_dimension_numbers<[1], [0], [0], [1], [0, 0, 1, 1], [], []>} : vector<8x128xf32>, vector<128x512xf32>, vector<8x512xf32> -> vector<8x512xf32>
    %20 = arith.addf %16, %19 : vector<8x512xf32>
    %21 = vector.extract_strided_slice %20 {offsets = [0, 0], sizes = [8, 128], strides = [1, 1]} : vector<8x512xf32> to vector<8x128xf32>
    %22 = arith.negf %21 : vector<8x128xf32>
    %23 = math.exp %22 : vector<8x128xf32>
    %cst_24 = arith.constant 1.000000e+00 : f32
    %24 = vector.broadcast %cst_24 : f32 to vector<8x128xf32>
    %25 = arith.addf %24, %23 : vector<8x128xf32>
    %26 = arith.divf %24, %25 : vector<8x128xf32>
    %27 = vector.extract_strided_slice %20 {offsets = [0, 128], sizes = [8, 128], strides = [1, 1]} : vector<8x512xf32> to vector<8x128xf32>
    %28 = arith.negf %27 : vector<8x128xf32>
    %29 = math.exp %28 : vector<8x128xf32>
    %cst_25 = arith.constant 1.000000e+00 : f32
    %30 = vector.broadcast %cst_25 : f32 to vector<8x128xf32>
    %31 = arith.addf %30, %29 : vector<8x128xf32>
    %32 = arith.divf %30, %31 : vector<8x128xf32>
    %33 = vector.extract_strided_slice %20 {offsets = [0, 256], sizes = [8, 128], strides = [1, 1]} : vector<8x512xf32> to vector<8x128xf32>
    %34 = math.tanh %33 : vector<8x128xf32>
    %35 = vector.extract_strided_slice %20 {offsets = [0, 384], sizes = [8, 128], strides = [1, 1]} : vector<8x512xf32> to vector<8x128xf32>
    %36 = arith.negf %35 : vector<8x128xf32>
    %37 = math.exp %36 : vector<8x128xf32>
    %cst_26 = arith.constant 1.000000e+00 : f32
    %38 = vector.broadcast %cst_26 : f32 to vector<8x128xf32>
    %39 = arith.addf %38, %37 : vector<8x128xf32>
    %40 = arith.divf %38, %39 : vector<8x128xf32>
    %c0_27 = arith.constant 0 : index
    %c0_28 = arith.constant 0 : index
    %41 = vector.load %arg7[%c0_27, %c0_28] : memref<8x128xf32, #tpu.memory_space<vmem>>, vector<8x128xf32>
    %42 = arith.mulf %32, %41 : vector<8x128xf32>
    %43 = arith.mulf %26, %34 : vector<8x128xf32>
    %44 = arith.addf %42, %43 : vector<8x128xf32>
    %45 = math.tanh %44 : vector<8x128xf32>
    %46 = arith.mulf %40, %45 : vector<8x128xf32>
    %c0_29 = arith.constant 0 : index
    %c0_30 = arith.constant 0 : index
    %47 = vector.load %arg7[%c0_29, %c0_30] : memref<8x128xf32, #tpu.memory_space<vmem>>, vector<8x128xf32>
    tpu.vector_store %arg7[%c0_29, %c0_30], %44 {strides = array<i32>} : memref<8x128xf32, #tpu.memory_space<vmem>>, vector<8x128xf32>,
    %c0_31 = arith.constant 0 : index
    %c0_32 = arith.constant 0 : index
    %48 = vector.load %arg6[%c0_31, %c0_32] : memref<8x128xf32, #tpu.memory_space<vmem>>, vector<8x128xf32>
    tpu.vector_store %arg6[%c0_31, %c0_32], %46 {strides = array<i32>} : memref<8x128xf32, #tpu.memory_space<vmem>>, vector<8x128xf32>,
    %c0_33 = arith.constant 0 : index
    %c0_34 = arith.constant 0 : index
    %49 = vector.load %arg4[%c0_33, %c0_34] : memref<8x1xi32, #tpu.memory_space<vmem>>, vector<8x1xi32>
    %c1_i32 = arith.constant 1 : i32
    %50 = vector.broadcast %c1_i32 : i32 to vector<8x1xi32>
    %51 = arith.subi %49, %50 : vector<8x1xi32>
    %52 = vector.broadcast %c0_i32 : i32 to vector<8x1xi32>
    %53 = arith.cmpi eq, %51, %52 : vector<8x1xi32>
    %c0_35 = arith.constant 0 : index
    %c0_36 = arith.constant 0 : index
    %54 = vector.load %arg5[%c0_35, %c0_36] : memref<8x128xf32, #tpu.memory_space<vmem>>, vector<8x128xf32>
    %55 = vector.shape_cast %53 : vector<8x1xi1> to vector<8x1xi1>
    %56 = vector.broadcast %55 : vector<8x1xi1> to vector<8x128xi1>
    %57 = arith.select %56, %46, %54 : vector<8x128xi1>, vector<8x128xf32>
    %c0_37 = arith.constant 0 : index
    %c0_38 = arith.constant 0 : index
    %58 = vector.load %arg5[%c0_37, %c0_38] : memref<8x128xf32, #tpu.memory_space<vmem>>, vector<8x128xf32>
    tpu.vector_store %arg5[%c0_37, %c0_38], %57 {strides = array<i32>} : memref<8x128xf32, #tpu.memory_space<vmem>>, vector<8x128xf32>,
    %c1_i32_39 = arith.constant 1 : i32
    %59 = arith.index_cast %c1_i32_39 : i32 to index
    %c0_40 = arith.constant 0 : index
    %c0_41 = arith.constant 0 : index
    %60 = vector.load %arg8[%59, %c0_40, %c0_41] : memref<6x8x512xf32, #tpu.memory_space<vmem>>, vector<1x8x512xf32>
    %61 = vector.shape_cast %60 : vector<1x8x512xf32> to vector<8x512xf32>
    %c0_42 = arith.constant 0 : index
    %c0_43 = arith.constant 0 : index
    %62 = vector.load %arg6[%c0_42, %c0_43] : memref<8x128xf32, #tpu.memory_space<vmem>>, vector<8x128xf32>
    %c0_44 = arith.constant 0 : index
    %c0_45 = arith.constant 0 : index
    %63 = vector.load %arg2[%c0_44, %c0_45] : memref<128x512xf32, #tpu.memory_space<vmem>>, vector<128x512xf32>
    %cst_46 = arith.constant dense<0.000000e+00> : vector<8x512xf32>
    %64 = tpu.matmul %62, %63, %cst_46 {dimension_numbers = #tpu.dot_dimension_numbers<[1], [0], [0], [1], [0, 0, 1, 1], [], []>} : vector<8x128xf32>, vector<128x512xf32>, vector<8x512xf32> -> vector<8x512xf32>
    %65 = arith.addf %61, %64 : vector<8x512xf32>
    %66 = vector.extract_strided_slice %65 {offsets = [0, 0], sizes = [8, 128], strides = [1, 1]} : vector<8x512xf32> to vector<8x128xf32>
    %67 = arith.negf %66 : vector<8x128xf32>
    %68 = math.exp %67 : vector<8x128xf32>
    %cst_47 = arith.constant 1.000000e+00 : f32
    %69 = vector.broadcast %cst_47 : f32 to vector<8x128xf32>
    %70 = arith.addf %69, %68 : vector<8x128xf32>
    %71 = arith.divf %69, %70 : vector<8x128xf32>
    %72 = vector.extract_strided_slice %65 {offsets = [0, 128], sizes = [8, 128], strides = [1, 1]} : vector<8x512xf32> to vector<8x128xf32>
    %73 = arith.negf %72 : vector<8x128xf32>
    %74 = math.exp %73 : vector<8x128xf32>
    %cst_48 = arith.constant 1.000000e+00 : f32
    %75 = vector.broadcast %cst_48 : f32 to vector<8x128xf32>
    %76 = arith.addf %75, %74 : vector<8x128xf32>
    %77 = arith.divf %75, %76 : vector<8x128xf32>
    %78 = vector.extract_strided_slice %65 {offsets = [0, 256], sizes = [8, 128], strides = [1, 1]} : vector<8x512xf32> to vector<8x128xf32>
    %79 = math.tanh %78 : vector<8x128xf32>
    %80 = vector.extract_strided_slice %65 {offsets = [0, 384], sizes = [8, 128], strides = [1, 1]} : vector<8x512xf32> to vector<8x128xf32>
    %81 = arith.negf %80 : vector<8x128xf32>
    %82 = math.exp %81 : vector<8x128xf32>
    %cst_49 = arith.constant 1.000000e+00 : f32
    %83 = vector.broadcast %cst_49 : f32 to vector<8x128xf32>
    %84 = arith.addf %83, %82 : vector<8x128xf32>
    %85 = arith.divf %83, %84 : vector<8x128xf32>
    %c0_50 = arith.constant 0 : index
    %c0_51 = arith.constant 0 : index
    %86 = vector.load %arg7[%c0_50, %c0_51] : memref<8x128xf32, #tpu.memory_space<vmem>>, vector<8x128xf32>
    %87 = arith.mulf %77, %86 : vector<8x128xf32>
    %88 = arith.mulf %71, %79 : vector<8x128xf32>
    %89 = arith.addf %87, %88 : vector<8x128xf32>
    %90 = math.tanh %89 : vector<8x128xf32>
    %91 = arith.mulf %85, %90 : vector<8x128xf32>
    %c0_52 = arith.constant 0 : index
    %c0_53 = arith.constant 0 : index
    %92 = vector.load %arg7[%c0_52, %c0_53] : memref<8x128xf32, #tpu.memory_space<vmem>>, vector<8x128xf32>
    tpu.vector_store %arg7[%c0_52, %c0_53], %89 {strides = array<i32>} : memref<8x128xf32, #tpu.memory_space<vmem>>, vector<8x128xf32>,
    %c0_54 = arith.constant 0 : index
    %c0_55 = arith.constant 0 : index
    %93 = vector.load %arg6[%c0_54, %c0_55] : memref<8x128xf32, #tpu.memory_space<vmem>>, vector<8x128xf32>
    tpu.vector_store %arg6[%c0_54, %c0_55], %91 {strides = array<i32>} : memref<8x128xf32, #tpu.memory_space<vmem>>, vector<8x128xf32>,
    %c0_56 = arith.constant 0 : index
    %c0_57 = arith.constant 0 : index
    %94 = vector.load %arg4[%c0_56, %c0_57] : memref<8x1xi32, #tpu.memory_space<vmem>>, vector<8x1xi32>
    %c1_i32_58 = arith.constant 1 : i32
    %95 = vector.broadcast %c1_i32_58 : i32 to vector<8x1xi32>
    %96 = arith.subi %94, %95 : vector<8x1xi32>
    %97 = vector.broadcast %c1_i32_39 : i32 to vector<8x1xi32>
    %98 = arith.cmpi eq, %96, %97 : vector<8x1xi32>
    %c0_59 = arith.constant 0 : index
    %c0_60 = arith.constant 0 : index
    %99 = vector.load %arg5[%c0_59, %c0_60] : memref<8x128xf32, #tpu.memory_space<vmem>>, vector<8x128xf32>
    %100 = vector.shape_cast %98 : vector<8x1xi1> to vector<8x1xi1>
    %101 = vector.broadcast %100 : vector<8x1xi1> to vector<8x128xi1>
    %102 = arith.select %101, %91, %99 : vector<8x128xi1>, vector<8x128xf32>
    %c0_61 = arith.constant 0 : index
    %c0_62 = arith.constant 0 : index
    %103 = vector.load %arg5[%c0_61, %c0_62] : memref<8x128xf32, #tpu.memory_space<vmem>>, vector<8x128xf32>
    tpu.vector_store %arg5[%c0_61, %c0_62], %102 {strides = array<i32>} : memref<8x128xf32, #tpu.memory_space<vmem>>, vector<8x128xf32>,
    %c2_i32 = arith.constant 2 : i32
    %104 = arith.index_cast %c2_i32 : i32 to index
    %c0_63 = arith.constant 0 : index
    %c0_64 = arith.constant 0 : index
    %105 = vector.load %arg8[%104, %c0_63, %c0_64] : memref<6x8x512xf32, #tpu.memory_space<vmem>>, vector<1x8x512xf32>
    %106 = vector.shape_cast %105 : vector<1x8x512xf32> to vector<8x512xf32>
    %c0_65 = arith.constant 0 : index
    %c0_66 = arith.constant 0 : index
    %107 = vector.load %arg6[%c0_65, %c0_66] : memref<8x128xf32, #tpu.memory_space<vmem>>, vector<8x128xf32>
    %c0_67 = arith.constant 0 : index
    %c0_68 = arith.constant 0 : index
    %108 = vector.load %arg2[%c0_67, %c0_68] : memref<128x512xf32, #tpu.memory_space<vmem>>, vector<128x512xf32>
    %cst_69 = arith.constant dense<0.000000e+00> : vector<8x512xf32>
    %109 = tpu.matmul %107, %108, %cst_69 {dimension_numbers = #tpu.dot_dimension_numbers<[1], [0], [0], [1], [0, 0, 1, 1], [], []>} : vector<8x128xf32>, vector<128x512xf32>, vector<8x512xf32> -> vector<8x512xf32>
    %110 = arith.addf %106, %109 : vector<8x512xf32>
    %111 = vector.extract_strided_slice %110 {offsets = [0, 0], sizes = [8, 128], strides = [1, 1]} : vector<8x512xf32> to vector<8x128xf32>
    %112 = arith.negf %111 : vector<8x128xf32>
    %113 = math.exp %112 : vector<8x128xf32>
    %cst_70 = arith.constant 1.000000e+00 : f32
    %114 = vector.broadcast %cst_70 : f32 to vector<8x128xf32>
    %115 = arith.addf %114, %113 : vector<8x128xf32>
    %116 = arith.divf %114, %115 : vector<8x128xf32>
    %117 = vector.extract_strided_slice %110 {offsets = [0, 128], sizes = [8, 128], strides = [1, 1]} : vector<8x512xf32> to vector<8x128xf32>
    %118 = arith.negf %117 : vector<8x128xf32>
    %119 = math.exp %118 : vector<8x128xf32>
    %cst_71 = arith.constant 1.000000e+00 : f32
    %120 = vector.broadcast %cst_71 : f32 to vector<8x128xf32>
    %121 = arith.addf %120, %119 : vector<8x128xf32>
    %122 = arith.divf %120, %121 : vector<8x128xf32>
    %123 = vector.extract_strided_slice %110 {offsets = [0, 256], sizes = [8, 128], strides = [1, 1]} : vector<8x512xf32> to vector<8x128xf32>
    %124 = math.tanh %123 : vector<8x128xf32>
    %125 = vector.extract_strided_slice %110 {offsets = [0, 384], sizes = [8, 128], strides = [1, 1]} : vector<8x512xf32> to vector<8x128xf32>
    %126 = arith.negf %125 : vector<8x128xf32>
    %127 = math.exp %126 : vector<8x128xf32>
    %cst_72 = arith.constant 1.000000e+00 : f32
    %128 = vector.broadcast %cst_72 : f32 to vector<8x128xf32>
    %129 = arith.addf %128, %127 : vector<8x128xf32>
    %130 = arith.divf %128, %129 : vector<8x128xf32>
    %c0_73 = arith.constant 0 : index
    %c0_74 = arith.constant 0 : index
    %131 = vector.load %arg7[%c0_73, %c0_74] : memref<8x128xf32, #tpu.memory_space<vmem>>, vector<8x128xf32>
    %132 = arith.mulf %122, %131 : vector<8x128xf32>
    %133 = arith.mulf %116, %124 : vector<8x128xf32>
    %134 = arith.addf %132, %133 : vector<8x128xf32>
    %135 = math.tanh %134 : vector<8x128xf32>
    %136 = arith.mulf %130, %135 : vector<8x128xf32>
    %c0_75 = arith.constant 0 : index
    %c0_76 = arith.constant 0 : index
    %137 = vector.load %arg7[%c0_75, %c0_76] : memref<8x128xf32, #tpu.memory_space<vmem>>, vector<8x128xf32>
    tpu.vector_store %arg7[%c0_75, %c0_76], %134 {strides = array<i32>} : memref<8x128xf32, #tpu.memory_space<vmem>>, vector<8x128xf32>,
    %c0_77 = arith.constant 0 : index
    %c0_78 = arith.constant 0 : index
    %138 = vector.load %arg6[%c0_77, %c0_78] : memref<8x128xf32, #tpu.memory_space<vmem>>, vector<8x128xf32>
    tpu.vector_store %arg6[%c0_77, %c0_78], %136 {strides = array<i32>} : memref<8x128xf32, #tpu.memory_space<vmem>>, vector<8x128xf32>,
    %c0_79 = arith.constant 0 : index
    %c0_80 = arith.constant 0 : index
    %139 = vector.load %arg4[%c0_79, %c0_80] : memref<8x1xi32, #tpu.memory_space<vmem>>, vector<8x1xi32>
    %c1_i32_81 = arith.constant 1 : i32
    %140 = vector.broadcast %c1_i32_81 : i32 to vector<8x1xi32>
    %141 = arith.subi %139, %140 : vector<8x1xi32>
    %142 = vector.broadcast %c2_i32 : i32 to vector<8x1xi32>
    %143 = arith.cmpi eq, %141, %142 : vector<8x1xi32>
    %c0_82 = arith.constant 0 : index
    %c0_83 = arith.constant 0 : index
    %144 = vector.load %arg5[%c0_82, %c0_83] : memref<8x128xf32, #tpu.memory_space<vmem>>, vector<8x128xf32>
    %145 = vector.shape_cast %143 : vector<8x1xi1> to vector<8x1xi1>
    %146 = vector.broadcast %145 : vector<8x1xi1> to vector<8x128xi1>
    %147 = arith.select %146, %136, %144 : vector<8x128xi1>, vector<8x128xf32>
    %c0_84 = arith.constant 0 : index
    %c0_85 = arith.constant 0 : index
    %148 = vector.load %arg5[%c0_84, %c0_85] : memref<8x128xf32, #tpu.memory_space<vmem>>, vector<8x128xf32>
    tpu.vector_store %arg5[%c0_84, %c0_85], %147 {strides = array<i32>} : memref<8x128xf32, #tpu.memory_space<vmem>>, vector<8x128xf32>,
    %c3_i32 = arith.constant 3 : i32
    %149 = arith.index_cast %c3_i32 : i32 to index
    %c0_86 = arith.constant 0 : index
    %c0_87 = arith.constant 0 : index
    %150 = vector.load %arg8[%149, %c0_86, %c0_87] : memref<6x8x512xf32, #tpu.memory_space<vmem>>, vector<1x8x512xf32>
    %151 = vector.shape_cast %150 : vector<1x8x512xf32> to vector<8x512xf32>
    %c0_88 = arith.constant 0 : index
    %c0_89 = arith.constant 0 : index
    %152 = vector.load %arg6[%c0_88, %c0_89] : memref<8x128xf32, #tpu.memory_space<vmem>>, vector<8x128xf32>
    %c0_90 = arith.constant 0 : index
    %c0_91 = arith.constant 0 : index
    %153 = vector.load %arg2[%c0_90, %c0_91] : memref<128x512xf32, #tpu.memory_space<vmem>>, vector<128x512xf32>
    %cst_92 = arith.constant dense<0.000000e+00> : vector<8x512xf32>
    %154 = tpu.matmul %152, %153, %cst_92 {dimension_numbers = #tpu.dot_dimension_numbers<[1], [0], [0], [1], [0, 0, 1, 1], [], []>} : vector<8x128xf32>, vector<128x512xf32>, vector<8x512xf32> -> vector<8x512xf32>
    %155 = arith.addf %151, %154 : vector<8x512xf32>
    %156 = vector.extract_strided_slice %155 {offsets = [0, 0], sizes = [8, 128], strides = [1, 1]} : vector<8x512xf32> to vector<8x128xf32>
    %157 = arith.negf %156 : vector<8x128xf32>
    %158 = math.exp %157 : vector<8x128xf32>
    %cst_93 = arith.constant 1.000000e+00 : f32
    %159 = vector.broadcast %cst_93 : f32 to vector<8x128xf32>
    %160 = arith.addf %159, %158 : vector<8x128xf32>
    %161 = arith.divf %159, %160 : vector<8x128xf32>
    %162 = vector.extract_strided_slice %155 {offsets = [0, 128], sizes = [8, 128], strides = [1, 1]} : vector<8x512xf32> to vector<8x128xf32>
    %163 = arith.negf %162 : vector<8x128xf32>
    %164 = math.exp %163 : vector<8x128xf32>
    %cst_94 = arith.constant 1.000000e+00 : f32
    %165 = vector.broadcast %cst_94 : f32 to vector<8x128xf32>
    %166 = arith.addf %165, %164 : vector<8x128xf32>
    %167 = arith.divf %165, %166 : vector<8x128xf32>
    %168 = vector.extract_strided_slice %155 {offsets = [0, 256], sizes = [8, 128], strides = [1, 1]} : vector<8x512xf32> to vector<8x128xf32>
    %169 = math.tanh %168 : vector<8x128xf32>
    %170 = vector.extract_strided_slice %155 {offsets = [0, 384], sizes = [8, 128], strides = [1, 1]} : vector<8x512xf32> to vector<8x128xf32>
    %171 = arith.negf %170 : vector<8x128xf32>
    %172 = math.exp %171 : vector<8x128xf32>
    %cst_95 = arith.constant 1.000000e+00 : f32
    %173 = vector.broadcast %cst_95 : f32 to vector<8x128xf32>
    %174 = arith.addf %173, %172 : vector<8x128xf32>
    %175 = arith.divf %173, %174 : vector<8x128xf32>
    %c0_96 = arith.constant 0 : index
    %c0_97 = arith.constant 0 : index
    %176 = vector.load %arg7[%c0_96, %c0_97] : memref<8x128xf32, #tpu.memory_space<vmem>>, vector<8x128xf32>
    %177 = arith.mulf %167, %176 : vector<8x128xf32>
    %178 = arith.mulf %161, %169 : vector<8x128xf32>
    %179 = arith.addf %177, %178 : vector<8x128xf32>
    %180 = math.tanh %179 : vector<8x128xf32>
    %181 = arith.mulf %175, %180 : vector<8x128xf32>
    %c0_98 = arith.constant 0 : index
    %c0_99 = arith.constant 0 : index
    %182 = vector.load %arg7[%c0_98, %c0_99] : memref<8x128xf32, #tpu.memory_space<vmem>>, vector<8x128xf32>
    tpu.vector_store %arg7[%c0_98, %c0_99], %179 {strides = array<i32>} : memref<8x128xf32, #tpu.memory_space<vmem>>, vector<8x128xf32>,
    %c0_100 = arith.constant 0 : index
    %c0_101 = arith.constant 0 : index
    %183 = vector.load %arg6[%c0_100, %c0_101] : memref<8x128xf32, #tpu.memory_space<vmem>>, vector<8x128xf32>
    tpu.vector_store %arg6[%c0_100, %c0_101], %181 {strides = array<i32>} : memref<8x128xf32, #tpu.memory_space<vmem>>, vector<8x128xf32>,
    %c0_102 = arith.constant 0 : index
    %c0_103 = arith.constant 0 : index
    %184 = vector.load %arg4[%c0_102, %c0_103] : memref<8x1xi32, #tpu.memory_space<vmem>>, vector<8x1xi32>
    %c1_i32_104 = arith.constant 1 : i32
    %185 = vector.broadcast %c1_i32_104 : i32 to vector<8x1xi32>
    %186 = arith.subi %184, %185 : vector<8x1xi32>
    %187 = vector.broadcast %c3_i32 : i32 to vector<8x1xi32>
    %188 = arith.cmpi eq, %186, %187 : vector<8x1xi32>
    %c0_105 = arith.constant 0 : index
    %c0_106 = arith.constant 0 : index
    %189 = vector.load %arg5[%c0_105, %c0_106] : memref<8x128xf32, #tpu.memory_space<vmem>>, vector<8x128xf32>
    %190 = vector.shape_cast %188 : vector<8x1xi1> to vector<8x1xi1>
    %191 = vector.broadcast %190 : vector<8x1xi1> to vector<8x128xi1>
    %192 = arith.select %191, %181, %189 : vector<8x128xi1>, vector<8x128xf32>
    %c0_107 = arith.constant 0 : index
    %c0_108 = arith.constant 0 : index
    %193 = vector.load %arg5[%c0_107, %c0_108] : memref<8x128xf32, #tpu.memory_space<vmem>>, vector<8x128xf32>
    tpu.vector_store %arg5[%c0_107, %c0_108], %192 {strides = array<i32>} : memref<8x128xf32, #tpu.memory_space<vmem>>, vector<8x128xf32>,
    %c4_i32 = arith.constant 4 : i32
    %194 = arith.index_cast %c4_i32 : i32 to index
    %c0_109 = arith.constant 0 : index
    %c0_110 = arith.constant 0 : index
    %195 = vector.load %arg8[%194, %c0_109, %c0_110] : memref<6x8x512xf32, #tpu.memory_space<vmem>>, vector<1x8x512xf32>
    %196 = vector.shape_cast %195 : vector<1x8x512xf32> to vector<8x512xf32>
    %c0_111 = arith.constant 0 : index
    %c0_112 = arith.constant 0 : index
    %197 = vector.load %arg6[%c0_111, %c0_112] : memref<8x128xf32, #tpu.memory_space<vmem>>, vector<8x128xf32>
    %c0_113 = arith.constant 0 : index
    %c0_114 = arith.constant 0 : index
    %198 = vector.load %arg2[%c0_113, %c0_114] : memref<128x512xf32, #tpu.memory_space<vmem>>, vector<128x512xf32>
    %cst_115 = arith.constant dense<0.000000e+00> : vector<8x512xf32>
    %199 = tpu.matmul %197, %198, %cst_115 {dimension_numbers = #tpu.dot_dimension_numbers<[1], [0], [0], [1], [0, 0, 1, 1], [], []>} : vector<8x128xf32>, vector<128x512xf32>, vector<8x512xf32> -> vector<8x512xf32>
    %200 = arith.addf %196, %199 : vector<8x512xf32>
    %201 = vector.extract_strided_slice %200 {offsets = [0, 0], sizes = [8, 128], strides = [1, 1]} : vector<8x512xf32> to vector<8x128xf32>
    %202 = arith.negf %201 : vector<8x128xf32>
    %203 = math.exp %202 : vector<8x128xf32>
    %cst_116 = arith.constant 1.000000e+00 : f32
    %204 = vector.broadcast %cst_116 : f32 to vector<8x128xf32>
    %205 = arith.addf %204, %203 : vector<8x128xf32>
    %206 = arith.divf %204, %205 : vector<8x128xf32>
    %207 = vector.extract_strided_slice %200 {offsets = [0, 128], sizes = [8, 128], strides = [1, 1]} : vector<8x512xf32> to vector<8x128xf32>
    %208 = arith.negf %207 : vector<8x128xf32>
    %209 = math.exp %208 : vector<8x128xf32>
    %cst_117 = arith.constant 1.000000e+00 : f32
    %210 = vector.broadcast %cst_117 : f32 to vector<8x128xf32>
    %211 = arith.addf %210, %209 : vector<8x128xf32>
    %212 = arith.divf %210, %211 : vector<8x128xf32>
    %213 = vector.extract_strided_slice %200 {offsets = [0, 256], sizes = [8, 128], strides = [1, 1]} : vector<8x512xf32> to vector<8x128xf32>
    %214 = math.tanh %213 : vector<8x128xf32>
    %215 = vector.extract_strided_slice %200 {offsets = [0, 384], sizes = [8, 128], strides = [1, 1]} : vector<8x512xf32> to vector<8x128xf32>
    %216 = arith.negf %215 : vector<8x128xf32>
    %217 = math.exp %216 : vector<8x128xf32>
    %cst_118 = arith.constant 1.000000e+00 : f32
    %218 = vector.broadcast %cst_118 : f32 to vector<8x128xf32>
    %219 = arith.addf %218, %217 : vector<8x128xf32>
    %220 = arith.divf %218, %219 : vector<8x128xf32>
    %c0_119 = arith.constant 0 : index
    %c0_120 = arith.constant 0 : index
    %221 = vector.load %arg7[%c0_119, %c0_120] : memref<8x128xf32, #tpu.memory_space<vmem>>, vector<8x128xf32>
    %222 = arith.mulf %212, %221 : vector<8x128xf32>
    %223 = arith.mulf %206, %214 : vector<8x128xf32>
    %224 = arith.addf %222, %223 : vector<8x128xf32>
    %225 = math.tanh %224 : vector<8x128xf32>
    %226 = arith.mulf %220, %225 : vector<8x128xf32>
    %c0_121 = arith.constant 0 : index
    %c0_122 = arith.constant 0 : index
    %227 = vector.load %arg7[%c0_121, %c0_122] : memref<8x128xf32, #tpu.memory_space<vmem>>, vector<8x128xf32>
    tpu.vector_store %arg7[%c0_121, %c0_122], %224 {strides = array<i32>} : memref<8x128xf32, #tpu.memory_space<vmem>>, vector<8x128xf32>,
    %c0_123 = arith.constant 0 : index
    %c0_124 = arith.constant 0 : index
    %228 = vector.load %arg6[%c0_123, %c0_124] : memref<8x128xf32, #tpu.memory_space<vmem>>, vector<8x128xf32>
    tpu.vector_store %arg6[%c0_123, %c0_124], %226 {strides = array<i32>} : memref<8x128xf32, #tpu.memory_space<vmem>>, vector<8x128xf32>,
    %c0_125 = arith.constant 0 : index
    %c0_126 = arith.constant 0 : index
    %229 = vector.load %arg4[%c0_125, %c0_126] : memref<8x1xi32, #tpu.memory_space<vmem>>, vector<8x1xi32>
    %c1_i32_127 = arith.constant 1 : i32
    %230 = vector.broadcast %c1_i32_127 : i32 to vector<8x1xi32>
    %231 = arith.subi %229, %230 : vector<8x1xi32>
    %232 = vector.broadcast %c4_i32 : i32 to vector<8x1xi32>
    %233 = arith.cmpi eq, %231, %232 : vector<8x1xi32>
    %c0_128 = arith.constant 0 : index
    %c0_129 = arith.constant 0 : index
    %234 = vector.load %arg5[%c0_128, %c0_129] : memref<8x128xf32, #tpu.memory_space<vmem>>, vector<8x128xf32>
    %235 = vector.shape_cast %233 : vector<8x1xi1> to vector<8x1xi1>
    %236 = vector.broadcast %235 : vector<8x1xi1> to vector<8x128xi1>
    %237 = arith.select %236, %226, %234 : vector<8x128xi1>, vector<8x128xf32>
    %c0_130 = arith.constant 0 : index
    %c0_131 = arith.constant 0 : index
    %238 = vector.load %arg5[%c0_130, %c0_131] : memref<8x128xf32, #tpu.memory_space<vmem>>, vector<8x128xf32>
    tpu.vector_store %arg5[%c0_130, %c0_131], %237 {strides = array<i32>} : memref<8x128xf32, #tpu.memory_space<vmem>>, vector<8x128xf32>,
    %c5_i32 = arith.constant 5 : i32
    %239 = arith.index_cast %c5_i32 : i32 to index
    %c0_132 = arith.constant 0 : index
    %c0_133 = arith.constant 0 : index
    %240 = vector.load %arg8[%239, %c0_132, %c0_133] : memref<6x8x512xf32, #tpu.memory_space<vmem>>, vector<1x8x512xf32>
    %241 = vector.shape_cast %240 : vector<1x8x512xf32> to vector<8x512xf32>
    %c0_134 = arith.constant 0 : index
    %c0_135 = arith.constant 0 : index
    %242 = vector.load %arg6[%c0_134, %c0_135] : memref<8x128xf32, #tpu.memory_space<vmem>>, vector<8x128xf32>
    %c0_136 = arith.constant 0 : index
    %c0_137 = arith.constant 0 : index
    %243 = vector.load %arg2[%c0_136, %c0_137] : memref<128x512xf32, #tpu.memory_space<vmem>>, vector<128x512xf32>
    %cst_138 = arith.constant dense<0.000000e+00> : vector<8x512xf32>
    %244 = tpu.matmul %242, %243, %cst_138 {dimension_numbers = #tpu.dot_dimension_numbers<[1], [0], [0], [1], [0, 0, 1, 1], [], []>} : vector<8x128xf32>, vector<128x512xf32>, vector<8x512xf32> -> vector<8x512xf32>
    %245 = arith.addf %241, %244 : vector<8x512xf32>
    %246 = vector.extract_strided_slice %245 {offsets = [0, 0], sizes = [8, 128], strides = [1, 1]} : vector<8x512xf32> to vector<8x128xf32>
    %247 = arith.negf %246 : vector<8x128xf32>
    %248 = math.exp %247 : vector<8x128xf32>
    %cst_139 = arith.constant 1.000000e+00 : f32
    %249 = vector.broadcast %cst_139 : f32 to vector<8x128xf32>
    %250 = arith.addf %249, %248 : vector<8x128xf32>
    %251 = arith.divf %249, %250 : vector<8x128xf32>
    %252 = vector.extract_strided_slice %245 {offsets = [0, 128], sizes = [8, 128], strides = [1, 1]} : vector<8x512xf32> to vector<8x128xf32>
    %253 = arith.negf %252 : vector<8x128xf32>
    %254 = math.exp %253 : vector<8x128xf32>
    %cst_140 = arith.constant 1.000000e+00 : f32
    %255 = vector.broadcast %cst_140 : f32 to vector<8x128xf32>
    %256 = arith.addf %255, %254 : vector<8x128xf32>
    %257 = arith.divf %255, %256 : vector<8x128xf32>
    %258 = vector.extract_strided_slice %245 {offsets = [0, 256], sizes = [8, 128], strides = [1, 1]} : vector<8x512xf32> to vector<8x128xf32>
    %259 = math.tanh %258 : vector<8x128xf32>
    %260 = vector.extract_strided_slice %245 {offsets = [0, 384], sizes = [8, 128], strides = [1, 1]} : vector<8x512xf32> to vector<8x128xf32>
    %261 = arith.negf %260 : vector<8x128xf32>
    %262 = math.exp %261 : vector<8x128xf32>
    %cst_141 = arith.constant 1.000000e+00 : f32
    %263 = vector.broadcast %cst_141 : f32 to vector<8x128xf32>
    %264 = arith.addf %263, %262 : vector<8x128xf32>
    %265 = arith.divf %263, %264 : vector<8x128xf32>
    %c0_142 = arith.constant 0 : index
    %c0_143 = arith.constant 0 : index
    %266 = vector.load %arg7[%c0_142, %c0_143] : memref<8x128xf32, #tpu.memory_space<vmem>>, vector<8x128xf32>
    %267 = arith.mulf %257, %266 : vector<8x128xf32>
    %268 = arith.mulf %251, %259 : vector<8x128xf32>
    %269 = arith.addf %267, %268 : vector<8x128xf32>
    %270 = math.tanh %269 : vector<8x128xf32>
    %271 = arith.mulf %265, %270 : vector<8x128xf32>
    %c0_144 = arith.constant 0 : index
    %c0_145 = arith.constant 0 : index
    %272 = vector.load %arg7[%c0_144, %c0_145] : memref<8x128xf32, #tpu.memory_space<vmem>>, vector<8x128xf32>
    tpu.vector_store %arg7[%c0_144, %c0_145], %269 {strides = array<i32>} : memref<8x128xf32, #tpu.memory_space<vmem>>, vector<8x128xf32>,
    %c0_146 = arith.constant 0 : index
    %c0_147 = arith.constant 0 : index
    %273 = vector.load %arg6[%c0_146, %c0_147] : memref<8x128xf32, #tpu.memory_space<vmem>>, vector<8x128xf32>
    tpu.vector_store %arg6[%c0_146, %c0_147], %271 {strides = array<i32>} : memref<8x128xf32, #tpu.memory_space<vmem>>, vector<8x128xf32>,
    %c0_148 = arith.constant 0 : index
    %c0_149 = arith.constant 0 : index
    %274 = vector.load %arg4[%c0_148, %c0_149] : memref<8x1xi32, #tpu.memory_space<vmem>>, vector<8x1xi32>
    %c1_i32_150 = arith.constant 1 : i32
    %275 = vector.broadcast %c1_i32_150 : i32 to vector<8x1xi32>
    %276 = arith.subi %274, %275 : vector<8x1xi32>
    %277 = vector.broadcast %c5_i32 : i32 to vector<8x1xi32>
    %278 = arith.cmpi eq, %276, %277 : vector<8x1xi32>
    %c0_151 = arith.constant 0 : index
    %c0_152 = arith.constant 0 : index
    %279 = vector.load %arg5[%c0_151, %c0_152] : memref<8x128xf32, #tpu.memory_space<vmem>>, vector<8x128xf32>
    %280 = vector.shape_cast %278 : vector<8x1xi1> to vector<8x1xi1>
    %281 = vector.broadcast %280 : vector<8x1xi1> to vector<8x128xi1>
    %282 = arith.select %281, %271, %279 : vector<8x128xi1>, vector<8x128xf32>
    %c0_153 = arith.constant 0 : index
    %c0_154 = arith.constant 0 : index
    %283 = vector.load %arg5[%c0_153, %c0_154] : memref<8x128xf32, #tpu.memory_space<vmem>>, vector<8x128xf32>
    tpu.vector_store %arg5[%c0_153, %c0_154], %282 {strides = array<i32>} : memref<8x128xf32, #tpu.memory_space<vmem>>, vector<8x128xf32>,
    %c6_i32 = arith.constant 6 : i32
    return
  }
}

</mosaic_0001>

<bundles_post_ra>
// kernel: encoder_forward.1
= control target key start
LH: loop header
LB: loop body
LE: loop exit
PB: predicated region body
PF: predicated region fallthrough
CT: control target
= control target key end

     0   :  { %vm77_vm0 = vcmask 130048   ;;  %s3075_s0 = inlined_call_operand.vmem [shape: bf16[48,16], index: 0, kind: input, shape index: {}]   ;;  %s3076_s1 = inlined_call_operand.vmem [shape: bf16[16,512], index: 1, kind: input, shape index: {}]   ;;  %s3077_s2 = inlined_call_operand.vmem [shape: f32[128,512], index: 2, kind: input, shape index: {}]   ;;  %s3078_s3 = inlined_call_operand.vmem [shape: f32[1,512], index: 3, kind: input, shape index: {}]   ;;  %s3079_s4 = inlined_call_operand.vmem [shape: s32[8,1], index: 4, kind: input, shape index: {}]   ;;  %s3080_s5 = inlined_call_operand.hbm [shape: f32[8,128], index: 5, kind: output, shape index: {}]  }
   0x1   :  { %v1625_v0 = vld [vmem:[%s3076_s1] sm:$0xf]  ;;  %v1680_v1 = vld [vmem:[%s3076_s1 + $0xc] sm:$0xf0]  ;;  %v1678_v2 = vld [vmem:[%s3076_s1 + $0x4] sm:$0xf] }
   0x2   :  { %v1626_v3 = vor.u32 %v1680_v1, %v1625_v0  ;;  %v1627_v4 = vld [vmem:[%s3076_s1 + $0x10] sm:$0xf0]  ;;  %v1633_v5 = vld [vmem:[%s3076_s1 + $0x8] sm:$0xf]  ;;  %v1681_v6 = vld [vmem:[%s3076_s1 + $0x14] sm:$0xf0] }
   0x3   :  { %v1630_v7 = vor.u32 %v1678_v2, %v1627_v4  ;;  %v1634_v8 = vor.u32 %v1681_v6, %v1633_v5  ;;  %v1679_v9 = vld [vmem:[%s3076_s1 + $0xc] sm:$0xf]  ;;  %v1635_v10 = vld [vmem:[%s3076_s1 + $0x18] sm:$0xf0]  ;;  %v1675_v11 = vld [vmem:[%s3075_s0] sm:$0xff] }
   0x4   :  { %94 = vmatpush.bf16.msra.mxu0 %v1626_v3  ;;  %v1638_v12 = vor.u32 %v1679_v9, %v1635_v10  ;;  %v1873_v13 = vld [vmem:[%s3077_s2 + $0x1e0] sm:$0xff]  ;;  %v1878_v14 = vld [vmem:[%s3077_s2 + $0x1e8] sm:$0xff]  ;;  %v1896_v17 = vld [vmem:[%s3077_s2 + $0x1f8] sm:$0xff] }
   0x5   :  { %118 = vmatpush.bf16.msra.mxu1 %v1630_v7  ;;  %142 = vmatpush.bf16.msra.mxu2 %v1634_v8  ;;  %v1884_v15 = vld [vmem:[%s3077_s2 + $0x1c0] sm:$0xff]  ;;  %v1891_v16 = vld [vmem:[%s3077_s2 + $0x1c8] sm:$0xff]  ;;  %v1915_v20 = vld [vmem:[%s3077_s2 + $0x1d8] sm:$0xff] }
   0x6   :  { %166 = vmatpush.bf16.msra.mxu3 %v1638_v12  ;;  %v1903_v18 = vld [vmem:[%s3077_s2 + $0x1a0] sm:$0xff]  ;;  %v1910_v19 = vld [vmem:[%s3077_s2 + $0x1a8] sm:$0xff]  ;;  %v1920_v21 = vld [vmem:[%s3077_s2 + $0x1f0] sm:$0xff] }
   0x7   :  { %1639 = vmatmul.msk.bf16.vlgmr.msra.gmra.mxu0 %vm77_vm0, %v1675_v11  ;;  %v1927_v22 = vld [vmem:[%s3077_s2 + $0x180] sm:$0xff]  ;;  %v1933_v23 = vld [vmem:[%s3077_s2 + $0x188] sm:$0xff]  ;;  %v1938_v24 = vld [vmem:[%s3077_s2 + $0x1b8] sm:$0xff] }
   0x8   :  { %279 = vmatpush.msrb.mxu0 %v1873_v13  ;;  %1642 = vmatmul.msk.bf16.vlgmr.msra.gmra.mxu1 %vm77_vm0, %v1675_v11  ;;  %v1944_v25 = vld [vmem:[%s3077_s2 + $0x1d0] sm:$0xff]  ;;  %v1951_v26 = vld [vmem:[%s3077_s2 + $0x160] sm:$0xff]  ;;  %v1962_v28 = vld [vmem:[%s3077_s2 + $0x168] sm:$0xff] }
   0x9   :  { %299 = vmatpush.msrb.mxu1 %v1878_v14  ;;  %1645 = vmatmul.msk.bf16.vlgmr.msra.gmra.mxu2 %vm77_vm0, %v1675_v11  ;;  %v1956_v27 = vld [vmem:[%s3077_s2 + $0x1b0] sm:$0xff]  ;;  %v1967_v29 = vld [vmem:[%s3077_s2 + $0x198] sm:$0xff]  ;;  %v1975_v30 = vld [vmem:[%s3077_s2 + $0x140] sm:$0xff] }
   0xa   :  { %1648 = vmatmul.msk.bf16.vlgmr.msra.gmra.mxu3 %vm77_vm0, %v1675_v11  ;;  %280 = vmatpush.msrb.mxu0 %v1884_v15  ;;  %v1980_v31 = vld [vmem:[%s3077_s2 + $0x190] sm:$0xff]  ;;  %v1986_v32 = vld [vmem:[%s3077_s2 + $0x148] sm:$0xff]  ;;  %v1991_v33 = vld [vmem:[%s3077_s2 + $0x178] sm:$0xff] }
   0xb   :  { %300 = vmatpush.msrb.mxu1 %v1891_v16  ;;  %339 = vmatpush.msrb.mxu3 %v1896_v17  ;;  %v1999_v34 = vld [vmem:[%s3077_s2 + $0x120] sm:$0xff]  ;;  %v2004_v35 = vld [vmem:[%s3077_s2 + $0x170] sm:$0xff]  ;;  %v2010_v36 = vld [vmem:[%s3077_s2 + $0x128] sm:$0xff] }
   0xc   :  { %281 = vmatpush.msrb.mxu0 %v1903_v18  ;;  %319 = vmatpush.msrb.mxu2 %v1920_v21  ;;  %v2015_v37 = vld [vmem:[%s3077_s2 + $0x158] sm:$0xff]  ;;  %v2023_v38 = vld [vmem:[%s3077_s2 + $0x100] sm:$0xff]  ;;  %v2028_v39 = vld [vmem:[%s3077_s2 + $0x150] sm:$0xff] }
   0xd   :  { %301 = vmatpush.msrb.mxu1 %v1910_v19  ;;  %340 = vmatpush.msrb.mxu3 %v1915_v20  ;;  %v1676_v40 = vld [vmem:[%s3075_s0 + $0x8] sm:$0xff]  ;;  %v2042_v42 = vld [vmem:[%s3077_s2 + $0x138] sm:$0xff]  ;;  %v2050_v43 = vld [vmem:[%s3077_s2 + $0x130] sm:$0xff] }
   0xe   :  { %282 = vmatpush.msrb.mxu0 %v1927_v22  ;;  %320 = vmatpush.msrb.mxu2 %v1944_v25  ;;  %v2037_v41 = vld [vmem:[%s3077_s2 + $0x108] sm:$0xff]  ;;  %v2059_v44 = vld [vmem:[%s3077_s2 + $0xe0] sm:$0xff]  ;;  %v2070_v46 = vld [vmem:[%s3077_s2 + $0x118] sm:$0xff] }
   0xf   :  { %302 = vmatpush.msrb.mxu1 %v1933_v23  ;;  %341 = vmatpush.msrb.mxu3 %v1938_v24  ;;  %v2065_v45 = vld [vmem:[%s3077_s2 + $0xe8] sm:$0xff]  ;;  %v2078_v47 = vld [vmem:[%s3077_s2 + $0xc0] sm:$0xff]  ;;  %v2083_v48 = vld [vmem:[%s3077_s2 + $0x110] sm:$0xff] }
  0x10   :  { %283 = vmatpush.msrb.mxu0 %v1951_v26  ;;  %321 = vmatpush.msrb.mxu2 %v1956_v27  ;;  %v2090_v49 = vld [vmem:[%s3077_s2 + $0xc8] sm:$0xff]  ;;  %v2095_v50 = vld [vmem:[%s3077_s2 + $0xf8] sm:$0xff]  ;;  %v2102_v51 = vld [vmem:[%s3077_s2 + $0xa0] sm:$0xff] }
  0x11   :  { %303 = vmatpush.msrb.mxu1 %v1962_v28  ;;  %342 = vmatpush.msrb.mxu3 %v1967_v29  ;;  %v2107_v52 = vld [vmem:[%s3077_s2 + $0xf0] sm:$0xff] }
  0x12   :  { %284 = vmatpush.msrb.mxu0 %v1975_v30  ;;  %322 = vmatpush.msrb.mxu2 %v1980_v31 }
  0x13   :  { %304 = vmatpush.msrb.mxu1 %v1986_v32  ;;  %343 = vmatpush.msrb.mxu3 %v1991_v33 }
  0x14   :  { %285 = vmatpush.msrb.mxu0 %v1999_v34  ;;  %323 = vmatpush.msrb.mxu2 %v2004_v35 }
  0x15   :  { %305 = vmatpush.msrb.mxu1 %v2010_v36  ;;  %344 = vmatpush.msrb.mxu3 %v2015_v37 }
  0x16   :  { %286 = vmatpush.msrb.mxu0 %v2023_v38  ;;  %324 = vmatpush.msrb.mxu2 %v2028_v39 }
  0x17   :  { %306 = vmatpush.msrb.mxu1 %v2037_v41  ;;  %345 = vmatpush.msrb.mxu3 %v2042_v42 }
  0x18   :  { %1640 = vmatmul.msk.bf16.gmra.mxu0 %vm77_vm0, %v1676_v40  ;;  %325 = vmatpush.msrb.mxu2 %v2050_v43 }
  0x19   :  { %1643 = vmatmul.msk.bf16.gmra.mxu1 %vm77_vm0, %v1676_v40  ;;  %1646 = vmatmul.msk.bf16.gmra.mxu2 %vm77_vm0, %v1676_v40 }
  0x1a   :  { %1649 = vmatmul.msk.bf16.gmra.mxu3 %vm77_vm0, %v1676_v40  ;;  %287 = vmatpush.msrb.mxu0 %v2059_v44 }
  0x1b   :  { %307 = vmatpush.msrb.mxu1 %v2065_v45  ;;  %346 = vmatpush.msrb.mxu3 %v2070_v46 }
  0x1c   :  { %10 = vsyncpa [#allocation6], 0  ;;  %288 = vmatpush.msrb.mxu0 %v2078_v47  ;;  %v2113_v53 = vld [vmem:[%s3077_s2 + $0xa8] sm:$0xff]  ;;  %326 = vmatpush.msrb.mxu2 %v2083_v48  ;;  %v2119_v54 = vld [vmem:[%s3077_s2 + $0xd8] sm:$0xff]  ;;  %s1602_s8 = sshll.u32 %s3080_s5, 4  ;;  %s1603_s8 = int_to_ptr.hbm [resolvable:$true] %s1602_s8 }
  0x1d   :  { %308 = vmatpush.msrb.mxu1 %v2090_v49  ;;  %347 = vmatpush.msrb.mxu3 %v2095_v50  ;;  %v2126_v55 = vld [vmem:[%s3077_s2 + $0x80] sm:$0xff]  ;;  %v2131_v56 = vld [vmem:[%s3077_s2 + $0xd0] sm:$0xff]  ;;  %v2137_v57 = vld [vmem:[%s3077_s2 + $0x88] sm:$0xff] }
  0x1e   :  { %289 = vmatpush.msrb.mxu0 %v2102_v51  ;;  %327 = vmatpush.msrb.mxu2 %v2107_v52  ;;  %v2143_v58 = vld [vmem:[%s3077_s2 + $0xb8] sm:$0xff]  ;;  %v2150_v59 = vld [vmem:[%s3077_s2 + $0x60] sm:$0xff]  ;;  %v2155_v60 = vld [vmem:[%s3077_s2 + $0xb0] sm:$0xff] }
  0x1f   :  { %309 = vmatpush.msrb.mxu1 %v2113_v53  ;;  %348 = vmatpush.msrb.mxu3 %v2119_v54  ;;  %v2162_v61 = vld [vmem:[%s3077_s2 + $0x68] sm:$0xff]  ;;  %v2167_v62 = vld [vmem:[%s3077_s2 + $0x98] sm:$0xff]  ;;  %v429_v63 = vld [vmem:[%s3079_s4] sm:$0xff] }
  0x20   :  { %290 = vmatpush.msrb.mxu0 %v2126_v55  ;;  %328 = vmatpush.msrb.mxu2 %v2131_v56  ;;  %v2177_v0 = vld [vmem:[%s3077_s2 + $0x40] sm:$0xff]  ;;  %v2182_v1 = vld [vmem:[%s3077_s2 + $0x90] sm:$0xff]  ;;  %v2189_v2 = vld [vmem:[%s3077_s2 + $0x48] sm:$0xff]  ;;  %v2208_v6 = vadd.s32 4294967295, %v429_v63 }
  0x21   :  { %310 = vmatpush.msrb.mxu1 %v2137_v57  ;;  %349 = vmatpush.msrb.mxu3 %v2143_v58  ;;  %v2194_v3 = vld [vmem:[%s3077_s2 + $0x78] sm:$0xff]  ;;  %v2201_v4 = vld [vmem:[%s3077_s2 + $0x70] sm:$0xff]  ;;  %v2206_v5 = vld [vmem:[%s3077_s2 + $0x20] sm:$0xff] }
  0x22   :  { %291 = vmatpush.msrb.mxu0 %v2150_v59  ;;  %329 = vmatpush.msrb.mxu2 %v2155_v60  ;;  %3123 = vst [vmem:[#allocation8_spill] sm:$0xff] %v2206_v5  ;;  %v1677_v7 = vld [vmem:[%s3075_s0 + $0x10] sm:$0xff]  ;;  %v2218_v8 = vld [vmem:[%s3077_s2 + $0x28] sm:$0xff]  ;;  %v2223_v9 = vld [vmem:[%s3077_s2 + $0x58] sm:$0xff]  ;;  %vm431_vm1 = vcmp.eq.s32.totalorder %v2208_v6, 0 }
  0x23   :  { %311 = vmatpush.msrb.mxu1 %v2162_v61  ;;  %350 = vmatpush.msrb.mxu3 %v2167_v62  ;;  %3124 = vst [vmem:[#allocation9_spill] sm:$0xff] %v2208_v6  ;;  %v2230_v10 = vld [vmem:[%s3077_s2 + $0x50] sm:$0xff]  ;;  %v2239_v11 = vld [vmem:[%s3077_s2] sm:$0xff]  ;;  %v2247_v12 = vld [vmem:[%s3077_s2 + $0x8] sm:$0xff] }
  0x24   :  { %292 = vmatpush.msrb.mxu0 %v2177_v0  ;;  %330 = vmatpush.msrb.mxu2 %v2182_v1  ;;  %3125 = vst [vmem:[#allocation10_spill] sm:$0xff] %v2218_v8  ;;  %v2252_v40 = vld [vmem:[%s3077_s2 + $0x30] sm:$0xff]  ;;  %v2259_v63 = vld [vmem:[%s3077_s2 + $0x38] sm:$0xff] }
  0x25   :  { %3126 = vst [vmem:[#allocation11_spill] sm:$0xff] %v2223_v9  ;;  %312 = vmatpush.msrb.mxu1 %v2189_v2  ;;  %351 = vmatpush.msrb.mxu3 %v2194_v3  ;;  %v2266_v6 = vld [vmem:[%s3077_s2 + $0x10] sm:$0xff] }
  0x26   :  { %331 = vmatpush.msrb.mxu2 %v2201_v4  ;;  %293 = vmatpush.msrb.mxu0 %v2206_v5 }
  0x27   :  { %313 = vmatpush.msrb.mxu1 %v2218_v8  ;;  %352 = vmatpush.msrb.mxu3 %v2223_v9  ;;  %v3089_v8 = vmov 0   ;;  %v2274_v9 = vld [vmem:[%s3077_s2 + $0x18] sm:$0xff] }
  0x28   :  { %1641 = vmatmul.msk.bf16.gmra.mxu0 %vm77_vm0, %v1677_v7  ;;  %332 = vmatpush.msrb.mxu2 %v2230_v10  ;;  %v433_v5 = vsel %vm431_vm1, 1, %v3089_v8 }
  0x29   :  { %1644 = vmatmul.msk.bf16.gmra.mxu1 %vm77_vm0, %v1677_v7  ;;  %1647 = vmatmul.msk.bf16.gmra.mxu2 %vm77_vm0, %v1677_v7 }
  0x2a   :  { %1650 = vmatmul.msk.bf16.gmra.mxu3 %vm77_vm0, %v1677_v7  ;;  %294 = vmatpush.msrb.mxu0 %v2239_v11 }
  0x2b   :  { %314 = vmatpush.msrb.mxu1 %v2247_v12  ;;  %333 = vmatpush.msrb.mxu2 %v2252_v40 }
  0x2c   :  { %353 = vmatpush.msrb.mxu3 %v2259_v63  ;;  %1685 = vset.pattern.permute.xlu0 %v3089_v8  ;;  %v3127_v7 = vld [vmem:[#allocation11_spill] sm:$0xff]  ;;  %v3129_v8 = vld [vmem:[#allocation10_spill] sm:$0xff] }
  0x2d   :  { %334 = vmatpush.msrb.mxu2 %v2266_v6  ;;  %435 = vperm.xlu0 %1685, %v433_v5   ;;  %v1811_v5 = vmov 0.0  }
  0x2e   :  { %354 = vmatpush.msrb.mxu3 %v2274_v9  ;;  %510 = vmatpush.msra.mxu0 %v1873_v13 }
  0x2f   :  { %530 = vmatpush.msra.mxu1 %v1878_v14  ;;  %550 = vmatpush.msra.mxu2 %v1920_v21 }
  0x30   :  { %570 = vmatpush.msra.mxu3 %v1896_v17  ;;  %511 = vmatpush.msra.mxu0 %v1884_v15 }
  0x31   :  { %531 = vmatpush.msra.mxu1 %v1891_v16  ;;  %551 = vmatpush.msra.mxu2 %v1944_v25 }
  0x32   :  { %571 = vmatpush.msra.mxu3 %v1915_v20  ;;  %512 = vmatpush.msra.mxu0 %v1903_v18 }
  0x33   :  { %532 = vmatpush.msra.mxu1 %v1910_v19  ;;  %552 = vmatpush.msra.mxu2 %v1956_v27 }
  0x34   :  { %572 = vmatpush.msra.mxu3 %v1938_v24  ;;  %513 = vmatpush.msra.mxu0 %v1927_v22 }
  0x35   :  { %533 = vmatpush.msra.mxu1 %v1933_v23  ;;  %553 = vmatpush.msra.mxu2 %v1980_v31 }
  0x36   :  { %573 = vmatpush.msra.mxu3 %v1967_v29  ;;  %514 = vmatpush.msra.mxu0 %v1951_v26 }
  0x37   :  { %534 = vmatpush.msra.mxu1 %v1962_v28  ;;  %554 = vmatpush.msra.mxu2 %v2004_v35 }
  0x38   :  { %295 = vmatmul.f32.vlgmr.msrb.gmra.mxu0 %v1811_v5  ;;  %574 = vmatpush.msra.mxu3 %v1991_v33 }
  0x39   :  { %315 = vmatmul.f32.vlgmr.msrb.gmra.mxu1 %v1811_v5  ;;  %335 = vmatmul.f32.vlgmr.msrb.gmra.mxu2 %v1811_v5 }
  0x3a   :  { %355 = vmatmul.f32.vlgmr.msrb.gmra.mxu3 %v1811_v5  ;;  %515 = vmatpush.msra.mxu0 %v1975_v30  ;;  %v3128_v5 = vld [vmem:[#allocation8_spill] sm:$0xff] }
  0x3b   :  { %535 = vmatpush.msra.mxu1 %v1986_v32  ;;  %555 = vmatpush.msra.mxu2 %v2028_v39 }
  0x3c   :  { %575 = vmatpush.msra.mxu3 %v2015_v37  ;;  %516 = vmatpush.msra.mxu0 %v1999_v34 }
  0x3d   :  { %536 = vmatpush.msra.mxu1 %v2010_v36  ;;  %556 = vmatpush.msra.mxu2 %v2050_v43 }
  0x3e   :  { %576 = vmatpush.msra.mxu3 %v2042_v42  ;;  %517 = vmatpush.msra.mxu0 %v2023_v38 }
  0x3f   :  { %537 = vmatpush.msra.mxu1 %v2037_v41  ;;  %557 = vmatpush.msra.mxu2 %v2083_v48 }
  0x40   :  { %577 = vmatpush.msra.mxu3 %v2070_v46  ;;  %518 = vmatpush.msra.mxu0 %v2059_v44 }
  0x41   :  { %538 = vmatpush.msra.mxu1 %v2065_v45  ;;  %558 = vmatpush.msra.mxu2 %v2107_v52 }
  0x42   :  { %578 = vmatpush.msra.mxu3 %v2095_v50  ;;  %519 = vmatpush.msra.mxu0 %v2078_v47 }
  0x43   :  { %539 = vmatpush.msra.mxu1 %v2090_v49  ;;  %559 = vmatpush.msra.mxu2 %v2131_v56 }
  0x44   :  { %579 = vmatpush.msra.mxu3 %v2119_v54  ;;  %520 = vmatpush.msra.mxu0 %v2102_v51 }
  0x45   :  { %540 = vmatpush.msra.mxu1 %v2113_v53  ;;  %560 = vmatpush.msra.mxu2 %v2155_v60 }
  0x46   :  { %580 = vmatpush.msra.mxu3 %v2143_v58  ;;  %521 = vmatpush.msra.mxu0 %v2126_v55 }
  0x47   :  { %541 = vmatpush.msra.mxu1 %v2137_v57  ;;  %561 = vmatpush.msra.mxu2 %v2182_v1 }
  0x48   :  { %581 = vmatpush.msra.mxu3 %v2167_v62  ;;  %522 = vmatpush.msra.mxu0 %v2150_v59 }
  0x49   :  { %542 = vmatpush.msra.mxu1 %v2162_v61  ;;  %562 = vmatpush.msra.mxu2 %v2201_v4 }
  0x4a   :  { %582 = vmatpush.msra.mxu3 %v2194_v3  ;;  %523 = vmatpush.msra.mxu0 %v2177_v0 }
  0x4b   :  { %543 = vmatpush.msra.mxu1 %v2189_v2  ;;  %563 = vmatpush.msra.mxu2 %v2230_v10 }
  0x4c   :  { %583 = vmatpush.msra.mxu3 %v3127_v7  ;;  %524 = vmatpush.msra.mxu0 %v3128_v5 }
  0x4d   :  { %544 = vmatpush.msra.mxu1 %v3129_v8  ;;  %564 = vmatpush.msra.mxu2 %v2252_v40 }
  0x4e   :  { %584 = vmatpush.msra.mxu3 %v2259_v63  ;;  %525 = vmatpush.msra.mxu0 %v2239_v11 }
  0x4f   :  { %545 = vmatpush.msra.mxu1 %v2247_v12  ;;  %565 = vmatpush.msra.mxu2 %v2266_v6 }
  0x50   :  { %585 = vmatpush.msra.mxu3 %v2274_v9  ;;  %741 = vmatpush.msrb.mxu0 %v1873_v13  ;;  %v3130_v13 = vmov 0  }
  0x51   :  { %761 = vmatpush.msrb.mxu1 %v1878_v14  ;;  %781 = vmatpush.msrb.mxu2 %v1920_v21 }
  0x52   :  { %801 = vmatpush.msrb.mxu3 %v1896_v17  ;;  %742 = vmatpush.msrb.mxu0 %v1884_v15 }
  0x53   :  { %762 = vmatpush.msrb.mxu1 %v1891_v16  ;;  %782 = vmatpush.msrb.mxu2 %v1944_v25  ;;  %v32_v16 = vld [vmem:[%s3078_s3] sm:$0xf] }
  0x54   :  { %802 = vmatpush.msrb.mxu3 %v1915_v20  ;;  %743 = vmatpush.msrb.mxu0 %v1903_v18  ;;  %v34_v17 = vperm.slane %v32_v16, 0  ;;  %v36_v25 = vperm.slane %v32_v16, 2 }
  0x55   :  { %763 = vmatpush.msrb.mxu1 %v1910_v19  ;;  %783 = vmatpush.msrb.mxu2 %v1956_v27  ;;  %v35_v19 = vperm.slane %v32_v16, 1 }
  0x56   :  { %803 = vmatpush.msrb.mxu3 %v1938_v24  ;;  %744 = vmatpush.msrb.mxu0 %v1927_v22 }
  0x57   :  { %764 = vmatpush.msrb.mxu1 %v1933_v23  ;;  %784 = vmatpush.msrb.mxu2 %v1980_v31 }
  0x58   :  { %804 = vmatpush.msrb.mxu3 %v1967_v29  ;;  %745 = vmatpush.msrb.mxu0 %v1951_v26  ;;  %v37_v26 = vperm.slane %v32_v16, 3  ;;  %v3143_v16 = vld [vmem:[#allocation9_spill] sm:$0xff] }
  0x59   :  { %765 = vmatpush.msrb.mxu1 %v1962_v28  ;;  %785 = vmatpush.msrb.mxu2 %v2004_v35  ;;  %vm662_vm2 = vcmp.eq.s32.totalorder %v3143_v16, 1  ;;  %vm893_vm15 = vcmp.eq.s32.totalorder %v3143_v16, 2 }
  0x5a   :  { %805 = vmatpush.msrb.mxu3 %v1991_v33  ;;  %746 = vmatpush.msrb.mxu0 %v1975_v30 }
  0x5b   :  { %766 = vmatpush.msrb.mxu1 %v1986_v32  ;;  %786 = vmatpush.msrb.mxu2 %v2028_v39 }
  0x5c   :  { %806 = vmatpush.msrb.mxu3 %v2015_v37  ;;  %747 = vmatpush.msrb.mxu0 %v1999_v34 }
  0x5d   :  { %767 = vmatpush.msrb.mxu1 %v2010_v36  ;;  %787 = vmatpush.msrb.mxu2 %v2050_v43 }
  0x5e   :  { %807 = vmatpush.msrb.mxu3 %v2042_v42  ;;  %748 = vmatpush.msrb.mxu0 %v2023_v38 }
  0x5f   :  { %768 = vmatpush.msrb.mxu1 %v2037_v41  ;;  %788 = vmatpush.msrb.mxu2 %v2083_v48 }
  0x60   :  { %808 = vmatpush.msrb.mxu3 %v2070_v46  ;;  %749 = vmatpush.msrb.mxu0 %v2059_v44 }
  0x61   :  { %769 = vmatpush.msrb.mxu1 %v2065_v45  ;;  %789 = vmatpush.msrb.mxu2 %v2107_v52 }
  0x62   :  { %809 = vmatpush.msrb.mxu3 %v2095_v50  ;;  %750 = vmatpush.msrb.mxu0 %v2078_v47 }
  0x63   :  { %770 = vmatpush.msrb.mxu1 %v2090_v49  ;;  %790 = vmatpush.msrb.mxu2 %v2131_v56 }
  0x64   :  { %810 = vmatpush.msrb.mxu3 %v2119_v54  ;;  %751 = vmatpush.msrb.mxu0 %v2102_v51 }
  0x65   :  { %771 = vmatpush.msrb.mxu1 %v2113_v53  ;;  %791 = vmatpush.msrb.mxu2 %v2155_v60 }
  0x66   :  { %811 = vmatpush.msrb.mxu3 %v2143_v58  ;;  %752 = vmatpush.msrb.mxu0 %v2126_v55 }
  0x67   :  { %772 = vmatpush.msrb.mxu1 %v2137_v57  ;;  %792 = vmatpush.msrb.mxu2 %v2182_v1 }
  0x68   :  { %812 = vmatpush.msrb.mxu3 %v2167_v62  ;;  %753 = vmatpush.msrb.mxu0 %v2150_v59 }
  0x69   :  { %773 = vmatpush.msrb.mxu1 %v2162_v61  ;;  %793 = vmatpush.msrb.mxu2 %v2201_v4 }
  0x6a   :  { %813 = vmatpush.msrb.mxu3 %v2194_v3  ;;  %754 = vmatpush.msrb.mxu0 %v2177_v0 }
  0x6b   :  { %774 = vmatpush.msrb.mxu1 %v2189_v2  ;;  %794 = vmatpush.msrb.mxu2 %v2230_v10 }
  0x6c   :  { %814 = vmatpush.msrb.mxu3 %v3127_v7  ;;  %755 = vmatpush.msrb.mxu0 %v3128_v5 }
  0x6d   :  { %775 = vmatpush.msrb.mxu1 %v3129_v8  ;;  %795 = vmatpush.msrb.mxu2 %v2252_v40 }
  0x6e   :  { %815 = vmatpush.msrb.mxu3 %v2259_v63  ;;  %756 = vmatpush.msrb.mxu0 %v2239_v11 }
  0x6f   :  { %776 = vmatpush.msrb.mxu1 %v2247_v12  ;;  %796 = vmatpush.msrb.mxu2 %v2266_v6 }
  0x70   :  { %816 = vmatpush.msrb.mxu3 %v2274_v9  ;;  %1686 = vset.pattern.permute.xlu1 %v3130_v13 }
  0x71   :  { %1687 = vset.pattern.permute.xlu2 %v3130_v13 }
  0x84   :  { %v96_v14 = vpop.f32.mrf.mxu0 }
  0x85   :  { %v120_v15 = vpop.f32.mrf.mxu1  ;;  %v97_v60 = vadd.f32 %v96_v14, %v34_v17 }
  0x86   :  { %v121_v62 = vadd.f32 %v120_v15, %v35_v19 }
  0x8c   :  { %v2413_v18 = vpop.f32.mrf.mxu2  ;;  %v98_v21 = vpop.f32.mrf.mxu0 }
  0x8d   :  { %v168_v20 = vpop.f32.mrf.mxu3  ;;  %v2415_v22 = vadd.f32 %v98_v21, %v34_v17  ;;  %v122_v23 = vpop.f32.mrf.mxu1  ;;  %v145_v21 = vadd.f32 %v2413_v18, %v36_v25 }
  0x8e   :  { %v2417_v24 = vadd.f32 %v122_v23, %v35_v19  ;;  %v169_v11 = vadd.f32 %v168_v20, %v37_v26 }
  0x94   :  { %v146_v27 = vpop.f32.mrf.mxu2 }
  0x95   :  { %v2419_v28 = vadd.f32 %v146_v27, %v36_v25  ;;  %v170_v29 = vpop.f32.mrf.mxu3  ;;  %v101_v30 = vpop.f32.mrf.mxu0 }
  0x96   :  { %v2421_v31 = vadd.f32 %v170_v29, %v37_v26  ;;  %v2423_v32 = vadd.f32 %v101_v30, %v34_v17  ;;  %v125_v33 = vpop.f32.mrf.mxu1 }
  0x97   :  { %v2425_v34 = vadd.f32 %v125_v33, %v35_v19 }
  0x9c   :  { %v149_v35 = vpop.f32.mrf.mxu2 }
  0x9d   :  { %v2427_v36 = vadd.f32 %v149_v35, %v36_v25  ;;  %v173_v37 = vpop.f32.mrf.mxu3  ;;  %v103_v38 = vpop.f32.mrf.mxu0 }
  0x9e   :  { %v2429_v39 = vadd.f32 %v173_v37, %v37_v26  ;;  %v2431_v41 = vadd.f32 %v103_v38, %v34_v17  ;;  %v127_v42 = vpop.f32.mrf.mxu1 }
  0x9f   :  { %v2433_v43 = vadd.f32 %v127_v42, %v35_v19 }
  0xa0   :  { %3131 = vst [vmem:[#allocation11_spill] sm:$0xff] %v2431_v41  ;;  %v2818_v41 = vld [vmem:[%s3077_s2 + $0x20] sm:$0xff] }
  0xa1   :  { %3132 = vst [vmem:[#allocation8_spill] sm:$0xff] %v2433_v43 }
  0xa4   :  { %v151_v44 = vpop.f32.mrf.mxu2 }
  0xa5   :  { %v2435_v45 = vadd.f32 %v151_v44, %v36_v25  ;;  %v175_v46 = vpop.f32.mrf.mxu3  ;;  %v106_v47 = vpop.f32.mrf.mxu0 }
  0xa6   :  { %v2437_v48 = vadd.f32 %v175_v46, %v37_v26  ;;  %v2439_v49 = vadd.f32 %v106_v47, %v34_v17  ;;  %v130_v50 = vpop.f32.mrf.mxu1 }
  0xa7   :  { %3133 = vst [vmem:[#allocation10_spill] sm:$0xff] %v2435_v45  ;;  %v2441_v51 = vadd.f32 %v130_v50, %v35_v19  ;;  %v2805_v45 = vld [vmem:[%s3077_s2 + $0x50] sm:$0xff] }
  0xa8   :  { %3134 = vst [vmem:[#allocation12_spill] sm:$0xff] %v2437_v48  ;;  %v2810_v48 = vld [vmem:[%s3077_s2 + $0x58] sm:$0xff] }
  0xa9   :  { %3135 = vst [vmem:[#allocation13_spill] sm:$0xff] %v2439_v49  ;;  %v2800_v49 = vld [vmem:[%s3077_s2 + $0x48] sm:$0xff] }
  0xaa   :  { %3136 = vst [vmem:[#allocation14_spill] sm:$0xff] %v2441_v51  ;;  %v2793_v51 = vld [vmem:[%s3077_s2 + $0x40] sm:$0xff] }
  0xab   :  { %3158 = vst [vmem:[#allocation34_spill] sm:$0xff] %v2793_v51 }
  0xac   :  { %v154_v52 = vpop.f32.mrf.mxu2  ;;  %3159 = vst [vmem:[#allocation35_spill] sm:$0xff] %v2800_v49 }
  0xad   :  { %v2443_v53 = vadd.f32 %v154_v52, %v36_v25  ;;  %v178_v54 = vpop.f32.mrf.mxu3  ;;  %v108_v55 = vpop.f32.mrf.mxu0  ;;  %3160 = vst [vmem:[#allocation36_spill] sm:$0xff] %v2810_v48 }
  0xae   :  { %v2445_v56 = vadd.f32 %v178_v54, %v37_v26  ;;  %v2447_v57 = vadd.f32 %v108_v55, %v34_v17  ;;  %v132_v58 = vpop.f32.mrf.mxu1 }
  0xaf   :  { %3137 = vst [vmem:[#allocation15_spill] sm:$0xff] %v2443_v53  ;;  %v2449_v59 = vadd.f32 %v132_v58, %v35_v19  ;;  %v664_v19 = vsel %vm662_vm2, 1, %v3130_v13  ;;  %v2776_v53 = vld [vmem:[%s3077_s2 + $0x68] sm:$0xff] }
  0xb0   :  { %3138 = vst [vmem:[#allocation16_spill] sm:$0xff] %v2445_v56  ;;  %666 = vperm.xlu0 %1685, %v664_v19   ;;  %v2788_v56 = vld [vmem:[%s3077_s2 + $0x78] sm:$0xff] }
  0xb1   :  { %3139 = vst [vmem:[#allocation17_spill] sm:$0xff] %v2447_v57  ;;  %v2771_v57 = vld [vmem:[%s3077_s2 + $0x60] sm:$0xff] }
  0xb2   :  { %3140 = vst [vmem:[#allocation18_spill] sm:$0xff] %v2449_v59  ;;  %v2766_v59 = vld [vmem:[%s3077_s2 + $0x98] sm:$0xff] }
  0xb3   :  { %3157 = vst [vmem:[#allocation33_spill] sm:$0xff] %v2788_v56 }
  0xb4   :  { %v156_v61 = vpop.f32.mrf.mxu2 }
  0xb5   :  { %v2451_v0 = vadd.f32 %v156_v61, %v36_v25  ;;  %v180_v1 = vpop.f32.mrf.mxu3  ;;  %v296_v2 = vpop.f32.mrf.mxu0 }
  0xb6   :  { %v2453_v3 = vadd.f32 %v180_v1, %v37_v26  ;;  %v359_v4 = vadd.f32 %v296_v2, %v97_v60  ;;  %v316_v6 = vpop.f32.mrf.mxu1 }
  0xb7   :  { %3141 = vst [vmem:[#allocation19_spill] sm:$0xff] %v2451_v0  ;;  %v360_v8 = vadd.f32 %v316_v6, %v121_v62  ;;  %v2742_v0 = vld [vmem:[%s3077_s2 + $0xb8] sm:$0xff] }
  0xb8   :  { %3142 = vst [vmem:[#allocation20_spill] sm:$0xff] %v2453_v3  ;;  %v1651_v9 = vmul.f32 -1.442695, %v359_v4  ;;  %v2749_v3 = vld [vmem:[%s3077_s2 + $0x80] sm:$0xff] }
  0xb9   :  { %v1652_v10 = vmul.f32 -1.442695, %v360_v8 }
  0xba   :  { %1688 = vpow2.f32 %v1651_v9 }
  0xbb   :  { %1690 = vpow2.f32 %v1652_v10 }
  0xbc   :  { %v336_v17 = vpop.f32.mrf.mxu2 }
  0xbd   :  { %v356_v12 = vpop.f32.mrf.mxu3  ;;  %v361_v26 = vadd.f32 %v336_v17, %v145_v21 }
  0xbe   :  { %v362_v40 = vadd.f32 %v356_v12, %v169_v11 }
  0xc0   :  { %v1689_v63 = vpop.eup %1688  ;;  %v1653_v7 = vmul.f32 -1.442695, %v362_v40 }
  0xc1   :  { %v1691_v5 = vpop.eup %1690  ;;  %v366_v14 = vadd.f32 1.0, %v1689_v63 }
  0xc2   :  { %v385_v15 = vadd.f32 1.0, %v1691_v5  ;;  %1692 = vpow2.f32 %v1653_v7 }
  0xc3   :  { %1694 = vrcp.f32 %v366_v14  ;;  %v378_v38 = vand.u32 2147483648, %v366_v14  ;;  %v376_v46 = vand.u32 2147483647, %v366_v14  ;;  %vm372_vm5 = vweird.f32 %v366_v14 }
  0xc4   :  { %1696 = vrcp.f32 %v385_v15  ;;  %v397_v42 = vand.u32 2147483648, %v385_v15  ;;  %v395_v18 = vand.u32 2147483647, %v385_v15  ;;  %vm391_vm6 = vweird.f32 %v385_v15 }
  0xc5   :  { %v379_v52 = vor.u32 1.1754944e-38, %v378_v38  ;;  %vm377_vm8 = vcmp.eq.f32.partialorder %v376_v46, 8.507059e+37 }
  0xc6   :  { %v398_v55 = vor.u32 1.1754944e-38, %v397_v42  ;;  %vm396_vm10 = vcmp.eq.f32.partialorder %v395_v18, 8.507059e+37 }
  0xc8   :  { %v1693_v23 = vpop.eup %1692 }
  0xc9   :  { %v1695_v20 = vpop.eup %1694  ;;  %v405_v27 = vadd.f32 1.0, %v1693_v23 }
  0xca   :  { %v1697_v29 = vpop.eup %1696  ;;  %v368_v30 = vmul.f32 %v1695_v20, %v366_v14  ;;  %vm373_vm3 = vweird.f32 %v1695_v20 }
  0xcb   :  { %v387_v33 = vmul.f32 %v1697_v29, %v385_v15  ;;  %1698 = vrcp.f32 %v405_v27  ;;  %vm392_vm4 = vweird.f32 %v1697_v29  ;;  %vm374_vm7 = vmor %vm372_vm5, %vm373_vm3  ;;  %v417_v12 = vand.u32 2147483648, %v405_v27 }
  0xcc   :  { %v369_v35 = vsub.f32 1.0, %v368_v30  ;;  %1700 = vtanh.f32 %v361_v26  ;;  %vm393_vm9 = vmor %vm391_vm6, %vm392_vm4  ;;  %vm411_vm12 = vweird.f32 %v405_v27  ;;  %v415_v40 = vand.u32 2147483647, %v405_v27 }
  0xcd   :  { %v388_v37 = vsub.f32 1.0, %v387_v33  ;;  %v418_v7 = vor.u32 1.1754944e-38, %v417_v12 }
  0xce   :  { %v370_v44 = vmul.f32 %v1695_v20, %v369_v35  ;;  %vm416_vm14 = vcmp.eq.f32.partialorder %v415_v40, 8.507059e+37 }
  0xcf   :  { %v389_v47 = vmul.f32 %v1697_v29, %v388_v37 }
  0xd0   :  { %v371_v25 = vadd.f32 %v1695_v20, %v370_v44 }
  0xd1   :  { %v1699_v50 = vpop.eup %1698  ;;  %v390_v54 = vadd.f32 %v1697_v29, %v389_v47 }
  0xd2   :  { %v375_v58 = vsel %vm374_vm7, %v1695_v20, %v371_v25  ;;  %v407_v60 = vmul.f32 %v1699_v50, %v405_v27  ;;  %v1701_v61 = vpop.eup %1700  ;;  %vm412_vm11 = vweird.f32 %v1699_v50 }
  0xd3   :  { %v380_v62 = vsel %vm377_vm8, %v379_v52, %v375_v58  ;;  %v394_v1 = vsel %vm393_vm9, %v1697_v29, %v390_v54  ;;  %vm413_vm13 = vmor %vm411_vm12, %vm412_vm11 }
  0xd4   :  { %v399_v2 = vsel %vm396_vm10, %v398_v55, %v394_v1  ;;  %v423_v4 = vmul.f32 %v1701_v61, %v380_v62  ;;  %v408_v6 = vsub.f32 1.0, %v407_v60 }
  0xd5   :  { %v422_v8 = vmul.f32 0.0, %v399_v2 }
  0xd6   :  { %v409_v9 = vmul.f32 %v1699_v50, %v408_v6 }
  0xd7   :  { %v2458_v10 = vadd.f32 %v423_v4, %v422_v8 }
  0xd8   :  { %v410_v11 = vadd.f32 %v1699_v50, %v409_v9 }
  0xd9   :  { %1702 = vtanh.f32 %v2458_v10 }
  0xda   :  { %v414_v63 = vsel %vm413_vm13, %v1699_v50, %v410_v11 }
  0xdb   :  { %v419_v14 = vsel %vm416_vm14, %v418_v7, %v414_v63  ;;  %v436_v63 = vpop.permute.xlu0 %435 }
  0xdc   :  { %vm437_vm11 = vcmp.eq.s32.totalorder %v436_v63, 1  ;;  %v2661_v63 = vld [vmem:[%s3077_s2 + $0x110] sm:$0xff] }
  0xdf   :  { %v1703_v5 = vpop.eup %1702 }
  0xe0   :  { %v2461_v15 = vmul.f32 %v1703_v5, %v419_v14 }
  0xe2   :  { %526 = vmatmul.f32.vlgmr.msra.gmra.mxu0 %v2461_v15  ;;  %546 = vmatmul.f32.vlgmr.msra.gmra.mxu1 %v2461_v15 }
  0xe3   :  { %566 = vmatmul.f32.vlgmr.msra.gmra.mxu2 %v2461_v15  ;;  %586 = vmatmul.f32.vlgmr.msra.gmra.mxu3 %v2461_v15 }
 0x15f   :  { %v527_v17 = vpop.f32.mrf.mxu0  ;;  %v547_v19 = vpop.f32.mrf.mxu1 }
 0x160   :  { %v590_v21 = vadd.f32 %v527_v17, %v2415_v22  ;;  %v591_v23 = vadd.f32 %v547_v19, %v2417_v24  ;;  %v895_v24 = vsel %vm893_vm15, 1, %v3130_v13 }
 0x161   :  { %897 = vperm.xlu1 %1686, %v895_v24   ;;  %v2500_v24 = vld [vmem:[%s3077_s2 + $0x1f8] sm:$0xff] }
 0x162   :  { %v1655_v20 = vmul.f32 -1.442695, %v590_v21  ;;  %v1656_v26 = vmul.f32 -1.442695, %v591_v23  ;;  %3146 = vst [vmem:[#allocation22_spill] sm:$0xff] %v2500_v24  ;;  %1032 = vmatpush.msra.mxu3 %v2500_v24 }
 0x164   :  { %1704 = vpow2.f32 %v1655_v20 }
 0x165   :  { %1706 = vpow2.f32 %v1656_v26  ;;  %v667_v26 = vpop.permute.xlu0 %666 }
 0x166   :  { %v587_v27 = vpop.f32.mrf.mxu3  ;;  %v567_v22 = vpop.f32.mrf.mxu2  ;;  %vm668_vm13 = vcmp.eq.s32.totalorder %v667_v26, 1  ;;  %v2699_v26 = vld [vmem:[%s3077_s2 + $0xc0] sm:$0xff] }
 0x167   :  { %v593_v29 = vadd.f32 %v587_v27, %v2421_v31  ;;  %v592_v47 = vadd.f32 %v567_v22, %v2419_v28  ;;  %v2488_v22 = vld [vmem:[%s3077_s2 + $0x1e8] sm:$0xff] }
 0x168   :  { %992 = vmatpush.msra.mxu1 %v2488_v22 }
 0x169   :  { %v1657_v30 = vmul.f32 -1.442695, %v593_v29 }
 0x16a   :  { %v1705_v33 = vpop.eup %1704 }
 0x16b   :  { %v1707_v35 = vpop.eup %1706  ;;  %v597_v37 = vadd.f32 1.0, %v1705_v33  ;;  %1708 = vpow2.f32 %v1657_v30 }
 0x16c   :  { %v616_v38 = vadd.f32 1.0, %v1707_v35  ;;  %v438_v35 = vsel %vm437_vm11, %v2461_v15, 0.0  ;;  %v2493_v15 = vld [vmem:[%s3077_s2 + $0x1f0] sm:$0xff] }
 0x16d   :  { %1710 = vrcp.f32 %v597_v37  ;;  %v609_v54 = vand.u32 2147483648, %v597_v37  ;;  %v607_v16 = vand.u32 2147483647, %v597_v37  ;;  %vm603_vm2 = vweird.f32 %v597_v37  ;;  %1012 = vmatpush.msra.mxu2 %v2493_v15 }
 0x16e   :  { %1712 = vrcp.f32 %v616_v38  ;;  %v628_v55 = vand.u32 2147483648, %v616_v38  ;;  %v626_v61 = vand.u32 2147483647, %v616_v38  ;;  %vm622_vm3 = vweird.f32 %v616_v38 }
 0x16f   :  { %v610_v28 = vor.u32 1.1754944e-38, %v609_v54  ;;  %vm608_vm6 = vcmp.eq.f32.partialorder %v607_v16, 8.507059e+37  ;;  %v2560_v54 = vld [vmem:[%s3077_s2 + $0x188] sm:$0xff]  ;;  %v2579_v16 = vld [vmem:[%s3077_s2 + $0x160] sm:$0xff] }
 0x170   :  { %v629_v6 = vor.u32 1.1754944e-38, %v628_v55  ;;  %vm627_vm7 = vcmp.eq.f32.partialorder %v626_v61, 8.507059e+37  ;;  %3150 = vst [vmem:[#allocation26_spill] sm:$0xff] %v2560_v54  ;;  %v2565_v55 = vld [vmem:[%s3077_s2 + $0x190] sm:$0xff] }
 0x171   :  { %v1709_v42 = vpop.eup %1708  ;;  %v2589_v61 = vld [vmem:[%s3077_s2 + $0x170] sm:$0xff] }
 0x172   :  { %v636_v44 = vadd.f32 1.0, %v1709_v42  ;;  %v2507_v42 = vld [vmem:[%s3077_s2 + $0x1c0] sm:$0xff]  ;;  %3151 = vst [vmem:[#allocation27_spill] sm:$0xff] %v2589_v61 }
 0x173   :  { %v1711_v46 = vpop.eup %1710  ;;  %3147 = vst [vmem:[#allocation23_spill] sm:$0xff] %v2507_v42 }
 0x174   :  { %v1713_v31 = vpop.eup %1712  ;;  %v599_v18 = vmul.f32 %v1711_v46, %v597_v37  ;;  %1714 = vrcp.f32 %v636_v44  ;;  %vm604_vm0 = vweird.f32 %v1711_v46  ;;  %v648_v23 = vand.u32 2147483648, %v636_v44 }
 0x175   :  { %v618_v25 = vmul.f32 %v1713_v31, %v616_v38  ;;  %1716 = vtanh.f32 %v592_v47  ;;  %vm623_vm1 = vweird.f32 %v1713_v31  ;;  %vm605_vm4 = vmor %vm603_vm2, %vm604_vm0  ;;  %vm642_vm9 = vweird.f32 %v636_v44  ;;  %v2483_v38 = vld [vmem:[%s3077_s2 + $0x1e0] sm:$0xff]  ;;  %v2524_v47 = vld [vmem:[%s3077_s2 + $0x1d8] sm:$0xff] }
 0x176   :  { %v600_v50 = vsub.f32 1.0, %v599_v18  ;;  %vm624_vm5 = vmor %vm622_vm3, %vm623_vm1  ;;  %v646_v20 = vand.u32 2147483647, %v636_v44  ;;  %v649_v29 = vor.u32 1.1754944e-38, %v648_v23  ;;  %3145 = vst [vmem:[#allocation21_spill] sm:$0xff] %v2483_v38  ;;  %972 = vmatpush.msra.mxu0 %v2483_v38  ;;  %1033 = vmatpush.msra.mxu3 %v2524_v47  ;;  %v2536_v18 = vld [vmem:[%s3077_s2 + $0x1a8] sm:$0xff] }
 0x177   :  { %v619_v52 = vsub.f32 1.0, %v618_v25  ;;  %v2541_v25 = vld [vmem:[%s3077_s2 + $0x1b0] sm:$0xff] }
 0x178   :  { %v601_v58 = vmul.f32 %v1711_v46, %v600_v50  ;;  %vm647_vm12 = vcmp.eq.f32.partialorder %v646_v20, 8.507059e+37  ;;  %973 = vmatpush.msra.mxu0 %v2507_v42  ;;  %v2548_v50 = vld [vmem:[%s3077_s2 + $0x1b8] sm:$0xff] }
 0x179   :  { %v620_v60 = vmul.f32 %v1713_v31, %v619_v52  ;;  %1034 = vmatpush.msra.mxu3 %v2548_v50  ;;  %v2555_v52 = vld [vmem:[%s3077_s2 + $0x180] sm:$0xff] }
 0x17a   :  { %v1715_v62 = vpop.eup %1714  ;;  %v602_v1 = vadd.f32 %v1711_v46, %v601_v58  ;;  %3149 = vst [vmem:[#allocation25_spill] sm:$0xff] %v2555_v52  ;;  %v2572_v58 = vld [vmem:[%s3077_s2 + $0x198] sm:$0xff] }
 0x17b   :  { %v621_v2 = vadd.f32 %v1713_v31, %v620_v60  ;;  %v638_v4 = vmul.f32 %v1715_v62, %v636_v44  ;;  %v1717_v9 = vpop.eup %1716  ;;  %vm643_vm8 = vweird.f32 %v1715_v62  ;;  %v2512_v44 = vld [vmem:[%s3077_s2 + $0x1c8] sm:$0xff]  ;;  %1035 = vmatpush.msra.mxu3 %v2572_v58 }
 0x17c   :  { %v606_v8 = vsel %vm605_vm4, %v1711_v46, %v602_v1  ;;  %vm644_vm10 = vmor %vm642_vm9, %vm643_vm8  ;;  %3148 = vst [vmem:[#allocation24_spill] sm:$0xff] %v2512_v44  ;;  %v2517_v46 = vld [vmem:[%s3077_s2 + $0x1d0] sm:$0xff]  ;;  %993 = vmatpush.msra.mxu1 %v2512_v44  ;;  %v2584_v60 = vld [vmem:[%s3077_s2 + $0x168] sm:$0xff] }
 0x17d   :  { %v611_v11 = vsel %vm608_vm6, %v610_v28, %v606_v8  ;;  %v625_v12 = vsel %vm624_vm5, %v1713_v31, %v621_v2  ;;  %v639_v40 = vsub.f32 1.0, %v638_v4  ;;  %1013 = vmatpush.msra.mxu2 %v2517_v46  ;;  %v2531_v31 = vld [vmem:[%s3077_s2 + $0x1a0] sm:$0xff]  ;;  %v2608_v28 = vld [vmem:[%s3077_s2 + $0x148] sm:$0xff]  ;;  %v2613_v2 = vld [vmem:[%s3077_s2 + $0x150] sm:$0xff] }
 0x17e   :  { %v630_v7 = vsel %vm627_vm7, %v629_v6, %v625_v12  ;;  %v654_v5 = vmul.f32 %v1717_v9, %v611_v11  ;;  %974 = vmatpush.msra.mxu0 %v2531_v31  ;;  %994 = vmatpush.msra.mxu1 %v2536_v18  ;;  %v2603_v1 = vld [vmem:[%s3077_s2 + $0x140] sm:$0xff]  ;;  %3152 = vst [vmem:[#allocation28_spill] sm:$0xff] %v2608_v28  ;;  %v2620_v4 = vld [vmem:[%s3077_s2 + $0x158] sm:$0xff]  ;;  %v2632_v8 = vld [vmem:[%s3077_s2 + $0x128] sm:$0xff] }
 0x17f   :  { %v653_v14 = vmul.f32 %v630_v7, %v2458_v10  ;;  %v640_v17 = vmul.f32 %v1715_v62, %v639_v40  ;;  %1014 = vmatpush.msra.mxu2 %v2541_v25  ;;  %v2627_v6 = vld [vmem:[%s3077_s2 + $0x120] sm:$0xff]  ;;  %3154 = vst [vmem:[#allocation30_spill] sm:$0xff] %v2632_v8  ;;  %v2637_v9 = vld [vmem:[%s3077_s2 + $0x130] sm:$0xff]  ;;  %v2644_v11 = vld [vmem:[%s3077_s2 + $0x138] sm:$0xff] }
 0x180   :  { %975 = vmatpush.msra.mxu0 %v2555_v52  ;;  %995 = vmatpush.msra.mxu1 %v2560_v54  ;;  %3153 = vst [vmem:[#allocation29_spill] sm:$0xff] %v2627_v6  ;;  %v2651_v12 = vld [vmem:[%s3077_s2 + $0x100] sm:$0xff]  ;;  %v2656_v40 = vld [vmem:[%s3077_s2 + $0x108] sm:$0xff]  ;;  %v2668_v7 = vld [vmem:[%s3077_s2 + $0x118] sm:$0xff] }
 0x181   :  { %v2474_v19 = vadd.f32 %v654_v5, %v653_v14  ;;  %v641_v21 = vadd.f32 %v1715_v62, %v640_v17  ;;  %1015 = vmatpush.msra.mxu2 %v2565_v55  ;;  %3155 = vst [vmem:[#allocation31_spill] sm:$0xff] %v2637_v9  ;;  %v2675_v5 = vld [vmem:[%s3077_s2 + $0xe0] sm:$0xff]  ;;  %v2680_v14 = vld [vmem:[%s3077_s2 + $0xe8] sm:$0xff]  ;;  %v2685_v17 = vld [vmem:[%s3077_s2 + $0xf0] sm:$0xff] }
 0x182   :  { %976 = vmatpush.msra.mxu0 %v2579_v16  ;;  %996 = vmatpush.msra.mxu1 %v2584_v60 }
 0x183   :  { %1718 = vtanh.f32 %v2474_v19  ;;  %v645_v27 = vsel %vm644_vm10, %v1715_v62, %v641_v21  ;;  %v2596_v62 = vld [vmem:[%s3077_s2 + $0x178] sm:$0xff]  ;;  %1016 = vmatpush.msra.mxu2 %v2589_v61 }
 0x184   :  { %v650_v33 = vsel %vm647_vm12, %v649_v29, %v645_v27  ;;  %1036 = vmatpush.msra.mxu3 %v2596_v62  ;;  %977 = vmatpush.msra.mxu0 %v2603_v1  ;;  %v2692_v21 = vld [vmem:[%s3077_s2 + $0xf8] sm:$0xff]  ;;  %v2704_v27 = vld [vmem:[%s3077_s2 + $0xc8] sm:$0xff]  ;;  %v2709_v29 = vld [vmem:[%s3077_s2 + $0xd0] sm:$0xff] }
 0x185   :  { %997 = vmatpush.msra.mxu1 %v2608_v28  ;;  %1017 = vmatpush.msra.mxu2 %v2613_v2 }
 0x186   :  { %1037 = vmatpush.msra.mxu3 %v2620_v4  ;;  %978 = vmatpush.msra.mxu0 %v2627_v6 }
 0x187   :  { %998 = vmatpush.msra.mxu1 %v2632_v8  ;;  %1018 = vmatpush.msra.mxu2 %v2637_v9 }
 0x188   :  { %1038 = vmatpush.msra.mxu3 %v2644_v11  ;;  %979 = vmatpush.msra.mxu0 %v2651_v12 }
 0x189   :  { %v1719_v30 = vpop.eup %1718  ;;  %999 = vmatpush.msra.mxu1 %v2656_v40  ;;  %1019 = vmatpush.msra.mxu2 %v2661_v63 }
 0x18a   :  { %v657_v10 = vmul.f32 %v1719_v30, %v650_v33  ;;  %1039 = vmatpush.msra.mxu3 %v2668_v7  ;;  %980 = vmatpush.msra.mxu0 %v2675_v5 }
 0x18b   :  { %1000 = vmatpush.msra.mxu1 %v2680_v14  ;;  %1020 = vmatpush.msra.mxu2 %v2685_v17 }
 0x18c   :  { %v2478_v37 = vsel %vm668_vm13, %v657_v10, %v438_v35  ;;  %757 = vmatmul.f32.vlgmr.msrb.gmra.mxu0 %v657_v10  ;;  %777 = vmatmul.f32.vlgmr.msrb.gmra.mxu1 %v657_v10  ;;  %v2725_v35 = vld [vmem:[%s3077_s2 + $0xa0] sm:$0xff] }
 0x18d   :  { %3144 = vst [vmem:[#allocation9_spill] sm:$0xff] %v2478_v37  ;;  %797 = vmatmul.f32.vlgmr.msrb.gmra.mxu2 %v657_v10  ;;  %817 = vmatmul.f32.vlgmr.msrb.gmra.mxu3 %v657_v10  ;;  %v2718_v10 = vld [vmem:[%s3077_s2 + $0xd8] sm:$0xff]  ;;  %v2823_v37 = vld [vmem:[%s3077_s2 + $0x28] sm:$0xff] }
 0x18e   :  { %1040 = vmatpush.msra.mxu3 %v2692_v21  ;;  %981 = vmatpush.msra.mxu0 %v2699_v26 }
 0x18f   :  { %1001 = vmatpush.msra.mxu1 %v2704_v27  ;;  %1021 = vmatpush.msra.mxu2 %v2709_v29 }
 0x190   :  { %1041 = vmatpush.msra.mxu3 %v2718_v10  ;;  %982 = vmatpush.msra.mxu0 %v2725_v35 }
 0x192   :  { %1042 = vmatpush.msra.mxu3 %v2742_v0  ;;  %983 = vmatpush.msra.mxu0 %v2749_v3 }
 0x194   :  { %1043 = vmatpush.msra.mxu3 %v2766_v59  ;;  %984 = vmatpush.msra.mxu0 %v2771_v57 }
 0x196   :  { %1044 = vmatpush.msra.mxu3 %v2788_v56  ;;  %985 = vmatpush.msra.mxu0 %v2793_v51 }
 0x198   :  { %1045 = vmatpush.msra.mxu3 %v2810_v48  ;;  %986 = vmatpush.msra.mxu0 %v2818_v41  ;;  %v2853_v48 = vld [vmem:[%s3077_s2 + $0x8] sm:$0xff] }
 0x199   :  { %3163 = vst [vmem:[#allocation39_spill] sm:$0xff] %v2853_v48 }
 0x209   :  { %v758_v23 = vpop.f32.mrf.mxu0  ;;  %v778_v20 = vpop.f32.mrf.mxu1 }
 0x20a   :  { %v821_v30 = vadd.f32 %v758_v23, %v2423_v32  ;;  %v822_v33 = vadd.f32 %v778_v20, %v2425_v34  ;;  %v2730_v32 = vld [vmem:[%s3077_s2 + $0xa8] sm:$0xff]  ;;  %v2735_v34 = vld [vmem:[%s3077_s2 + $0xb0] sm:$0xff] }
 0x20b   :  { %1002 = vmatpush.msra.mxu1 %v2730_v32  ;;  %1022 = vmatpush.msra.mxu2 %v2735_v34 }
 0x20c   :  { %v1659_v23 = vmul.f32 -1.442695, %v821_v30  ;;  %v1660_v20 = vmul.f32 -1.442695, %v822_v33  ;;  %v2754_v30 = vld [vmem:[%s3077_s2 + $0x88] sm:$0xff]  ;;  %v2759_v33 = vld [vmem:[%s3077_s2 + $0x90] sm:$0xff] }
 0x20d   :  { %1003 = vmatpush.msra.mxu1 %v2754_v30  ;;  %1023 = vmatpush.msra.mxu2 %v2759_v33 }
 0x20e   :  { %1720 = vpow2.f32 %v1659_v23  ;;  %v2783_v23 = vld [vmem:[%s3077_s2 + $0x70] sm:$0xff] }
 0x20f   :  { %1722 = vpow2.f32 %v1660_v20  ;;  %3156 = vst [vmem:[#allocation32_spill] sm:$0xff] %v2783_v23  ;;  %1004 = vmatpush.msra.mxu1 %v2776_v53  ;;  %1024 = vmatpush.msra.mxu2 %v2783_v23 }
 0x210   :  { %v818_v20 = vpop.f32.mrf.mxu3 }
 0x211   :  { %v824_v43 = vadd.f32 %v818_v20, %v2429_v39  ;;  %1005 = vmatpush.msra.mxu1 %v2800_v49  ;;  %v2830_v39 = vld [vmem:[%s3077_s2 + $0x30] sm:$0xff]  ;;  %v2835_v20 = vld [vmem:[%s3077_s2 + $0x38] sm:$0xff]  ;;  %1025 = vmatpush.msra.mxu2 %v2805_v45 }
 0x212   :  { %3161 = vst [vmem:[#allocation37_spill] sm:$0xff] %v2835_v20  ;;  %1046 = vmatpush.msra.mxu3 %v2835_v20  ;;  %v2867_v20 = vld [vmem:[%s3077_s2 + $0x18] sm:$0xff] }
 0x213   :  { %v1661_v56 = vmul.f32 -1.442695, %v824_v43  ;;  %1006 = vmatpush.msra.mxu1 %v2823_v37  ;;  %1026 = vmatpush.msra.mxu2 %v2830_v39  ;;  %v2848_v43 = vld [vmem:[%s3077_s2] sm:$0xff]  ;;  %3164 = vst [vmem:[#allocation40_spill] sm:$0xff] %v2867_v20 }
 0x214   :  { %v1721_v23 = vpop.eup %1720  ;;  %3162 = vst [vmem:[#allocation38_spill] sm:$0xff] %v2848_v43  ;;  %987 = vmatpush.msra.mxu0 %v2848_v43  ;;  %1047 = vmatpush.msra.mxu3 %v2867_v20  ;;  %v798_v43 = vpop.f32.mrf.mxu2 }
 0x215   :  { %v1723_v49 = vpop.eup %1722  ;;  %v2841_v51 = vadd.f32 1.0, %v1721_v23  ;;  %1724 = vpow2.f32 %v1661_v56  ;;  %v2858_v23 = vld [vmem:[%s3077_s2 + $0x10] sm:$0xff]  ;;  %1007 = vmatpush.msra.mxu1 %v2853_v48  ;;  %s1812_s2 = smov [#allocation5]  }
 0x216   :  { %v2860_v56 = vadd.f32 1.0, %v1723_v49  ;;  %1027 = vmatpush.msra.mxu2 %v2858_v23  ;;  %v1122_v49 = vld [vmem:[%s3079_s4] sm:$0xff]  ;;  %1203 = vmatpush.msrb.mxu0 %v2483_v38  ;;  %s1600_s4 = sshll.u32 %s1812_s2, 4  ;;  %s1601_s4 = int_to_ptr.vmem [resolvable:$true] %s1600_s4 }
 0x217   :  { %1726 = vrcp.f32 %v2841_v51  ;;  %1223 = vmatpush.msrb.mxu1 %v2488_v22  ;;  %v2878_v48 = vadd.s32 4294967295, %v1122_v49  ;;  %1263 = vmatpush.msrb.mxu3 %v2500_v24  ;;  %vm834_vm1 = vweird.f32 %v2841_v51 }
 0x218   :  { %1728 = vrcp.f32 %v2860_v56  ;;  %1243 = vmatpush.msrb.mxu2 %v2493_v15  ;;  %1204 = vmatpush.msrb.mxu0 %v2507_v42  ;;  %v823_v42 = vadd.f32 %v798_v43, %v2427_v36  ;;  %v840_v43 = vand.u32 2147483648, %v2841_v51  ;;  %vm853_vm2 = vweird.f32 %v2860_v56 }
 0x219   :  { %3165 = vst [vmem:[#allocation41_spill] sm:$0xff] %v2878_v48  ;;  %1224 = vmatpush.msrb.mxu1 %v2512_v44  ;;  %vm1124_vm14 = vcmp.eq.s32.totalorder %v2878_v48, 3  ;;  %1264 = vmatpush.msrb.mxu3 %v2524_v47 }
 0x21a   :  { %1244 = vmatpush.msrb.mxu2 %v2517_v46  ;;  %v1126_v49 = vsel %vm1124_vm14, 1, %v3130_v13  ;;  %1205 = vmatpush.msrb.mxu0 %v2531_v31 }
 0x21b   :  { %v1725_v20 = vpop.eup %1724  ;;  %1225 = vmatpush.msrb.mxu1 %v2536_v18  ;;  %1128 = vperm.xlu1 %1686, %v1126_v49   ;;  %v859_v49 = vand.u32 2147483648, %v2860_v56 }
 0x21c   :  { %v2887_v38 = vadd.f32 1.0, %v1725_v20  ;;  %1245 = vmatpush.msrb.mxu2 %v2541_v25  ;;  %1265 = vmatpush.msrb.mxu3 %v2548_v50 }
 0x21d   :  { %v1727_v24 = vpop.eup %1726  ;;  %1206 = vmatpush.msrb.mxu0 %v2555_v52  ;;  %1226 = vmatpush.msrb.mxu1 %v2560_v54  ;;  %v838_v54 = vand.u32 2147483647, %v2841_v51 }
 0x21e   :  { %v1729_v44 = vpop.eup %1728  ;;  %v830_v48 = vmul.f32 %v1727_v24, %v2841_v51  ;;  %1730 = vrcp.f32 %v2887_v38  ;;  %1246 = vmatpush.msrb.mxu2 %v2565_v55  ;;  %1266 = vmatpush.msrb.mxu3 %v2572_v58  ;;  %vm835_vm15 = vweird.f32 %v1727_v24  ;;  %v860_v51 = vor.u32 1.1754944e-38, %v859_v49  ;;  %v3167_v49 = vld [vmem:[#allocation33_spill] sm:$0xff] }
 0x21f   :  { %v849_v20 = vmul.f32 %v1729_v44, %v2860_v56  ;;  %1207 = vmatpush.msrb.mxu0 %v2579_v16  ;;  %1732 = vtanh.f32 %v823_v42  ;;  %1227 = vmatpush.msrb.mxu1 %v2584_v60  ;;  %vm854_vm0 = vweird.f32 %v1729_v44  ;;  %vm836_vm3 = vmor %vm834_vm1, %vm835_vm15  ;;  %vm839_vm5 = vcmp.eq.f32.partialorder %v838_v54, 8.507059e+37 }
 0x220   :  { %v831_v13 = vsub.f32 1.0, %v830_v48  ;;  %1247 = vmatpush.msrb.mxu2 %v2589_v61  ;;  %1267 = vmatpush.msrb.mxu3 %v2596_v62  ;;  %vm855_vm4 = vmor %vm853_vm2, %vm854_vm0  ;;  %vm873_vm8 = vweird.f32 %v2887_v38 }
 0x221   :  { %v850_v36 = vsub.f32 1.0, %v849_v20  ;;  %1208 = vmatpush.msrb.mxu0 %v2603_v1  ;;  %v857_v20 = vand.u32 2147483647, %v2860_v56  ;;  %1228 = vmatpush.msrb.mxu1 %v2608_v28 }
 0x222   :  { %v832_v52 = vmul.f32 %v1727_v24, %v831_v13  ;;  %1248 = vmatpush.msrb.mxu2 %v2613_v2  ;;  %1268 = vmatpush.msrb.mxu3 %v2620_v4  ;;  %v841_v13 = vor.u32 1.1754944e-38, %v840_v43 }
 0x223   :  { %v851_v48 = vmul.f32 %v1729_v44, %v850_v36  ;;  %1209 = vmatpush.msrb.mxu0 %v2627_v6  ;;  %1229 = vmatpush.msrb.mxu1 %v2632_v8  ;;  %vm858_vm6 = vcmp.eq.f32.partialorder %v857_v20, 8.507059e+37  ;;  %v3168_v20 = vld [vmem:[#allocation34_spill] sm:$0xff] }
 0x224   :  { %v2913_v42 = vpop.eup %1730  ;;  %v833_v61 = vadd.f32 %v1727_v24, %v832_v52  ;;  %1249 = vmatpush.msrb.mxu2 %v2637_v9  ;;  %1269 = vmatpush.msrb.mxu3 %v2644_v11 }
 0x225   :  { %v852_v36 = vadd.f32 %v1729_v44, %v851_v48  ;;  %v869_v28 = vmul.f32 %v2913_v42, %v2887_v38  ;;  %1210 = vmatpush.msrb.mxu0 %v2651_v12  ;;  %v1733_v56 = vpop.eup %1732  ;;  %1230 = vmatpush.msrb.mxu1 %v2656_v40  ;;  %vm874_vm7 = vweird.f32 %v2913_v42 }
 0x226   :  { %v837_v52 = vsel %vm836_vm3, %v1727_v24, %v833_v61  ;;  %1250 = vmatpush.msrb.mxu2 %v2661_v63  ;;  %1270 = vmatpush.msrb.mxu3 %v2668_v7  ;;  %vm875_vm9 = vmor %vm873_vm8, %vm874_vm7 }
 0x227   :  { %v842_v6 = vsel %vm839_vm5, %v841_v13, %v837_v52  ;;  %v856_v43 = vsel %vm855_vm4, %v1729_v44, %v852_v36  ;;  %v870_v48 = vsub.f32 1.0, %v869_v28  ;;  %1211 = vmatpush.msrb.mxu0 %v2675_v5  ;;  %1231 = vmatpush.msrb.mxu1 %v2680_v14  ;;  %v877_v28 = vand.u32 2147483647, %v2887_v38  ;;  %v3170_v52 = vld [vmem:[#allocation36_spill] sm:$0xff] }
 0x228   :  { %v861_v8 = vsel %vm858_vm6, %v860_v51, %v856_v43  ;;  %v885_v9 = vmul.f32 %v1733_v56, %v842_v6  ;;  %1251 = vmatpush.msrb.mxu2 %v2685_v17  ;;  %1271 = vmatpush.msrb.mxu3 %v2692_v21  ;;  %v898_v6 = vpop.permute.xlu1 %897  ;;  %v3169_v51 = vld [vmem:[#allocation35_spill] sm:$0xff]  ;;  %v3171_v56 = vld [vmem:[#allocation9_spill] sm:$0xff] }
 0x229   :  { %v884_v24 = vmul.f32 %v861_v8, %v2474_v19  ;;  %v871_v54 = vmul.f32 %v2913_v42, %v870_v48  ;;  %1212 = vmatpush.msrb.mxu0 %v2699_v26  ;;  %1232 = vmatpush.msrb.mxu1 %v2704_v27  ;;  %v879_v19 = vand.u32 2147483648, %v2887_v38  ;;  %v3166_v38 = vld [vmem:[#allocation32_spill] sm:$0xff]  ;;  %vm878_vm10 = vcmp.eq.f32.partialorder %v877_v28, 8.507059e+37  ;;  %v3172_v48 = vld [vmem:[#allocation37_spill] sm:$0xff]  ;;  %v3177_v28 = vld [vmem:[#allocation22_spill] sm:$0xff] }
 0x22a   :  { %1252 = vmatpush.msrb.mxu2 %v2709_v29  ;;  %1272 = vmatpush.msrb.mxu3 %v2718_v10  ;;  %vm899_vm11 = vcmp.eq.s32.totalorder %v898_v6, 1  ;;  %v3178_v6 = vld [vmem:[#allocation23_spill] sm:$0xff] }
 0x22b   :  { %v2937_v44 = vadd.f32 %v885_v9, %v884_v24  ;;  %v872_v61 = vadd.f32 %v2913_v42, %v871_v54  ;;  %1213 = vmatpush.msrb.mxu0 %v2725_v35  ;;  %1233 = vmatpush.msrb.mxu1 %v2730_v32  ;;  %v880_v9 = vor.u32 1.1754944e-38, %v879_v19  ;;  %v3173_v24 = vld [vmem:[#allocation38_spill] sm:$0xff]  ;;  %v3174_v54 = vld [vmem:[#allocation39_spill] sm:$0xff]  ;;  %v3176_v19 = vld [vmem:[#allocation21_spill] sm:$0xff] }
 0x22c   :  { %1253 = vmatpush.msrb.mxu2 %v2735_v34  ;;  %1273 = vmatpush.msrb.mxu3 %v2742_v0 }
 0x22d   :  { %1734 = vtanh.f32 %v2937_v44  ;;  %1214 = vmatpush.msrb.mxu0 %v2749_v3  ;;  %1234 = vmatpush.msrb.mxu1 %v2754_v30  ;;  %v876_v8 = vsel %vm875_vm9, %v2913_v42, %v872_v61  ;;  %v3175_v61 = vld [vmem:[#allocation40_spill] sm:$0xff] }
 0x22e   :  { %1254 = vmatpush.msrb.mxu2 %v2759_v33  ;;  %1274 = vmatpush.msrb.mxu3 %v2766_v59  ;;  %v881_v36 = vsel %vm878_vm10, %v880_v9, %v876_v8  ;;  %v3179_v8 = vld [vmem:[#allocation24_spill] sm:$0xff] }
 0x22f   :  { %1215 = vmatpush.msrb.mxu0 %v2771_v57  ;;  %1235 = vmatpush.msrb.mxu1 %v2776_v53 }
 0x230   :  { %1255 = vmatpush.msrb.mxu2 %v3166_v38  ;;  %1275 = vmatpush.msrb.mxu3 %v3167_v49 }
 0x231   :  { %1216 = vmatpush.msrb.mxu0 %v3168_v20  ;;  %1236 = vmatpush.msrb.mxu1 %v3169_v51 }
 0x232   :  { %1256 = vmatpush.msrb.mxu2 %v2805_v45  ;;  %1276 = vmatpush.msrb.mxu3 %v3170_v52 }
 0x233   :  { %v1735_v13 = vpop.eup %1734  ;;  %1217 = vmatpush.msrb.mxu0 %v2818_v41  ;;  %1237 = vmatpush.msrb.mxu1 %v2823_v37 }
 0x234   :  { %v888_v42 = vmul.f32 %v1735_v13, %v881_v36  ;;  %1257 = vmatpush.msrb.mxu2 %v2830_v39  ;;  %1277 = vmatpush.msrb.mxu3 %v3172_v48 }
 0x235   :  { %1218 = vmatpush.msrb.mxu0 %v3173_v24  ;;  %1238 = vmatpush.msrb.mxu1 %v3174_v54 }
 0x236   :  { %v2969_v43 = vsel %vm899_vm11, %v888_v42, %v3171_v56  ;;  %988 = vmatmul.f32.vlgmr.msra.gmra.mxu0 %v888_v42  ;;  %1008 = vmatmul.f32.vlgmr.msra.gmra.mxu1 %v888_v42 }
 0x237   :  { %1028 = vmatmul.f32.vlgmr.msra.gmra.mxu2 %v888_v42  ;;  %1048 = vmatmul.f32.vlgmr.msra.gmra.mxu3 %v888_v42 }
 0x238   :  { %1258 = vmatpush.msrb.mxu2 %v2858_v23  ;;  %1278 = vmatpush.msrb.mxu3 %v3175_v61 }
 0x239   :  { %1434 = vmatpush.msra.mxu0 %v3176_v19  ;;  %1454 = vmatpush.msra.mxu1 %v2488_v22  ;;  %v3180_v22 = vld [vmem:[#allocation25_spill] sm:$0xff] }
 0x23a   :  { %1474 = vmatpush.msra.mxu2 %v2493_v15  ;;  %1494 = vmatpush.msra.mxu3 %v3177_v28  ;;  %v3181_v15 = vld [vmem:[#allocation26_spill] sm:$0xff] }
 0x23b   :  { %1435 = vmatpush.msra.mxu0 %v3178_v6  ;;  %1455 = vmatpush.msra.mxu1 %v3179_v8 }
 0x23c   :  { %1475 = vmatpush.msra.mxu2 %v2517_v46  ;;  %1495 = vmatpush.msra.mxu3 %v2524_v47  ;;  %v3182_v46 = vld [vmem:[#allocation27_spill] sm:$0xff]  ;;  %v3183_v47 = vld [vmem:[#allocation28_spill] sm:$0xff] }
 0x23d   :  { %1436 = vmatpush.msra.mxu0 %v2531_v31  ;;  %1456 = vmatpush.msra.mxu1 %v2536_v18  ;;  %v3184_v31 = vld [vmem:[#allocation29_spill] sm:$0xff]  ;;  %v3185_v18 = vld [vmem:[#allocation30_spill] sm:$0xff] }
 0x23e   :  { %1476 = vmatpush.msra.mxu2 %v2541_v25  ;;  %1496 = vmatpush.msra.mxu3 %v2548_v50  ;;  %v3186_v25 = vld [vmem:[#allocation31_spill] sm:$0xff] }
 0x23f   :  { %1437 = vmatpush.msra.mxu0 %v3180_v22  ;;  %1457 = vmatpush.msra.mxu1 %v3181_v15 }
 0x240   :  { %1477 = vmatpush.msra.mxu2 %v2565_v55  ;;  %1497 = vmatpush.msra.mxu3 %v2572_v58  ;;  %v3189_v55 = vld [vmem:[#allocation12_spill] sm:$0xff] }
 0x241   :  { %1438 = vmatpush.msra.mxu0 %v2579_v16  ;;  %1458 = vmatpush.msra.mxu1 %v2584_v60 }
 0x242   :  { %1478 = vmatpush.msra.mxu2 %v3182_v46  ;;  %1498 = vmatpush.msra.mxu3 %v2596_v62 }
 0x243   :  { %1439 = vmatpush.msra.mxu0 %v2603_v1  ;;  %1459 = vmatpush.msra.mxu1 %v3183_v47 }
 0x244   :  { %1479 = vmatpush.msra.mxu2 %v2613_v2  ;;  %1499 = vmatpush.msra.mxu3 %v2620_v4  ;;  %v3190_v4 = vld [vmem:[#allocation41_spill] sm:$0xff] }
 0x245   :  { %1440 = vmatpush.msra.mxu0 %v3184_v31  ;;  %1460 = vmatpush.msra.mxu1 %v3185_v18  ;;  %vm1355_vm12 = vcmp.eq.s32.totalorder %v3190_v4, 4  ;;  %vm1586_vm10 = vcmp.eq.s32.totalorder %v3190_v4, 5 }
 0x246   :  { %1480 = vmatpush.msra.mxu2 %v3186_v25  ;;  %1500 = vmatpush.msra.mxu3 %v2644_v11 }
 0x247   :  { %1441 = vmatpush.msra.mxu0 %v2651_v12  ;;  %1461 = vmatpush.msra.mxu1 %v2656_v40  ;;  %v3191_v12 = vmov 0  }
 0x248   :  { %1481 = vmatpush.msra.mxu2 %v2661_v63  ;;  %1501 = vmatpush.msra.mxu3 %v2668_v7  ;;  %v1357_v40 = vsel %vm1355_vm12, 1, %v3191_v12 }
 0x249   :  { %1442 = vmatpush.msra.mxu0 %v2675_v5  ;;  %1462 = vmatpush.msra.mxu1 %v2680_v14  ;;  %v3192_v14 = vld [vmem:[#allocation10_spill] sm:$0xff] }
 0x24a   :  { %1482 = vmatpush.msra.mxu2 %v2685_v17  ;;  %1502 = vmatpush.msra.mxu3 %v2692_v21 }
 0x24b   :  { %1443 = vmatpush.msra.mxu0 %v2699_v26  ;;  %1463 = vmatpush.msra.mxu1 %v2704_v27 }
 0x24c   :  { %1483 = vmatpush.msra.mxu2 %v2709_v29  ;;  %1503 = vmatpush.msra.mxu3 %v2718_v10 }
 0x24d   :  { %1444 = vmatpush.msra.mxu0 %v2725_v35  ;;  %1464 = vmatpush.msra.mxu1 %v2730_v32 }
 0x24e   :  { %1484 = vmatpush.msra.mxu2 %v2735_v34  ;;  %1504 = vmatpush.msra.mxu3 %v2742_v0  ;;  %v3188_v0 = vld [vmem:[#allocation8_spill] sm:$0xff] }
 0x24f   :  { %1445 = vmatpush.msra.mxu0 %v2749_v3  ;;  %1465 = vmatpush.msra.mxu1 %v2754_v30 }
 0x250   :  { %1485 = vmatpush.msra.mxu2 %v2759_v33  ;;  %1505 = vmatpush.msra.mxu3 %v2766_v59 }
 0x251   :  { %1446 = vmatpush.msra.mxu0 %v2771_v57  ;;  %1466 = vmatpush.msra.mxu1 %v2776_v53  ;;  %v3187_v57 = vld [vmem:[#allocation11_spill] sm:$0xff] }
 0x252   :  { %1486 = vmatpush.msra.mxu2 %v3166_v38  ;;  %1506 = vmatpush.msra.mxu3 %v3167_v49 }
 0x253   :  { %1447 = vmatpush.msra.mxu0 %v3168_v20  ;;  %1467 = vmatpush.msra.mxu1 %v3169_v51 }
 0x254   :  { %1487 = vmatpush.msra.mxu2 %v2805_v45  ;;  %1507 = vmatpush.msra.mxu3 %v3170_v52 }
 0x255   :  { %1448 = vmatpush.msra.mxu0 %v2818_v41  ;;  %1468 = vmatpush.msra.mxu1 %v2823_v37 }
 0x256   :  { %1488 = vmatpush.msra.mxu2 %v2830_v39  ;;  %1508 = vmatpush.msra.mxu3 %v3172_v48 }
 0x257   :  { %1449 = vmatpush.msra.mxu0 %v3173_v24  ;;  %1469 = vmatpush.msra.mxu1 %v3174_v54 }
 0x258   :  { %1489 = vmatpush.msra.mxu2 %v2858_v23  ;;  %1509 = vmatpush.msra.mxu3 %v3175_v61 }
 0x259   :  { %1359 = vperm.xlu2 %1687, %v1357_v40  }
 0x28d   :  { %v1129_v22 = vpop.permute.xlu1 %1128 }
 0x28e   :  { %vm1130_vm9 = vcmp.eq.s32.totalorder %v1129_v22, 1 }
 0x2b3   :  { %v989_v53 = vpop.f32.mrf.mxu0  ;;  %v1009_v45 = vpop.f32.mrf.mxu1 }
 0x2b4   :  { %v1052_v59 = vadd.f32 %v989_v53, %v3187_v57  ;;  %v1053_v41 = vadd.f32 %v1009_v45, %v3188_v0  ;;  %v3193_v45 = vld [vmem:[#allocation13_spill] sm:$0xff] }
 0x2b6   :  { %v1663_v3 = vmul.f32 -1.442695, %v1052_v59  ;;  %v1664_v37 = vmul.f32 -1.442695, %v1053_v41  ;;  %v3194_v59 = vld [vmem:[#allocation14_spill] sm:$0xff] }
 0x2b8   :  { %1736 = vpow2.f32 %v1663_v3 }
 0x2b9   :  { %1738 = vpow2.f32 %v1664_v37 }
 0x2ba   :  { %v1049_v50 = vpop.f32.mrf.mxu3  ;;  %v1029_v11 = vpop.f32.mrf.mxu2 }
 0x2bb   :  { %v1055_v58 = vadd.f32 %v1049_v50, %v3189_v55  ;;  %v1054_v17 = vadd.f32 %v1029_v11, %v3192_v14  ;;  %v3195_v50 = vld [vmem:[#allocation16_spill] sm:$0xff] }
 0x2bd   :  { %v1665_v16 = vmul.f32 -1.442695, %v1055_v58 }
 0x2be   :  { %v1737_v60 = vpop.eup %1736 }
 0x2bf   :  { %v1739_v62 = vpop.eup %1738  ;;  %v1059_v1 = vadd.f32 1.0, %v1737_v60  ;;  %1740 = vpow2.f32 %v1665_v16 }
 0x2c0   :  { %v1078_v2 = vadd.f32 1.0, %v1739_v62 }
 0x2c1   :  { %1742 = vrcp.f32 %v1059_v1  ;;  %v1071_v35 = vand.u32 2147483648, %v1059_v1  ;;  %v1069_v30 = vand.u32 2147483647, %v1059_v1  ;;  %vm1065_vm15 = vweird.f32 %v1059_v1 }
 0x2c2   :  { %1744 = vrcp.f32 %v1078_v2  ;;  %v1090_v32 = vand.u32 2147483648, %v1078_v2  ;;  %v1088_v39 = vand.u32 2147483647, %v1078_v2  ;;  %vm1084_vm0 = vweird.f32 %v1078_v2 }
 0x2c3   :  { %v1072_v38 = vor.u32 1.1754944e-38, %v1071_v35  ;;  %vm1070_vm3 = vcmp.eq.f32.partialorder %v1069_v30, 8.507059e+37 }
 0x2c4   :  { %v1091_v13 = vor.u32 1.1754944e-38, %v1090_v32  ;;  %vm1089_vm4 = vcmp.eq.f32.partialorder %v1088_v39, 8.507059e+37 }
 0x2c5   :  { %v1741_v63 = vpop.eup %1740 }
 0x2c6   :  { %v1098_v7 = vadd.f32 1.0, %v1741_v63 }
 0x2c7   :  { %v1743_v5 = vpop.eup %1742 }
 0x2c8   :  { %v1745_v21 = vpop.eup %1744  ;;  %v1061_v26 = vmul.f32 %v1743_v5, %v1059_v1  ;;  %1746 = vrcp.f32 %v1098_v7  ;;  %vm1066_vm13 = vweird.f32 %v1743_v5  ;;  %v1110_v6 = vand.u32 2147483648, %v1098_v7 }
 0x2c9   :  { %v1080_v27 = vmul.f32 %v1745_v21, %v1078_v2  ;;  %1748 = vtanh.f32 %v1054_v17  ;;  %vm1085_vm14 = vweird.f32 %v1745_v21  ;;  %vm1067_vm1 = vmor %vm1065_vm15, %vm1066_vm13  ;;  %vm1104_vm6 = vweird.f32 %v1098_v7 }
 0x2ca   :  { %v1062_v29 = vsub.f32 1.0, %v1061_v26  ;;  %vm1086_vm2 = vmor %vm1084_vm0, %vm1085_vm14  ;;  %v1108_v8 = vand.u32 2147483647, %v1098_v7  ;;  %v1111_v46 = vor.u32 1.1754944e-38, %v1110_v6  ;;  %v1588_v2 = vsel %vm1586_vm10, 1, %v3191_v12 }
 0x2cb   :  { %v1081_v10 = vsub.f32 1.0, %v1080_v27  ;;  %1590 = vperm.xlu2 %1687, %v1588_v2  }
 0x2cc   :  { %v1063_v34 = vmul.f32 %v1743_v5, %v1062_v29  ;;  %vm1109_vm8 = vcmp.eq.f32.partialorder %v1108_v8, 8.507059e+37 }
 0x2cd   :  { %v1082_v33 = vmul.f32 %v1745_v21, %v1081_v10 }
 0x2ce   :  { %v1747_v23 = vpop.eup %1746  ;;  %v1064_v9 = vadd.f32 %v1743_v5, %v1063_v34 }
 0x2cf   :  { %v1083_v49 = vadd.f32 %v1745_v21, %v1082_v33  ;;  %v1100_v20 = vmul.f32 %v1747_v23, %v1098_v7  ;;  %v1749_v51 = vpop.eup %1748  ;;  %vm1105_vm5 = vweird.f32 %v1747_v23  ;;  %v3196_v7 = vld [vmem:[#allocation15_spill] sm:$0xff] }
 0x2d0   :  { %v1068_v36 = vsel %vm1067_vm1, %v1743_v5, %v1064_v9  ;;  %vm1106_vm7 = vmor %vm1104_vm6, %vm1105_vm5 }
 0x2d1   :  { %v1073_v42 = vsel %vm1070_vm3, %v1072_v38, %v1068_v36  ;;  %v1087_v52 = vsel %vm1086_vm2, %v1745_v21, %v1083_v49  ;;  %v1101_v56 = vsub.f32 1.0, %v1100_v20 }
 0x2d2   :  { %v1092_v48 = vsel %vm1089_vm4, %v1091_v13, %v1087_v52  ;;  %v1116_v24 = vmul.f32 %v1749_v51, %v1073_v42 }
 0x2d3   :  { %v1115_v54 = vmul.f32 %v1092_v48, %v2937_v44  ;;  %v1102_v61 = vmul.f32 %v1747_v23, %v1101_v56 }
 0x2d5   :  { %v3047_v19 = vadd.f32 %v1116_v24, %v1115_v54  ;;  %v1103_v28 = vadd.f32 %v1747_v23, %v1102_v61 }
 0x2d7   :  { %1750 = vtanh.f32 %v3047_v19  ;;  %v1107_v15 = vsel %vm1106_vm7, %v1747_v23, %v1103_v28  ;;  %v1360_v28 = vpop.permute.xlu2 %1359 }
 0x2d8   :  { %v1112_v31 = vsel %vm1109_vm8, %v1111_v46, %v1107_v15  ;;  %vm1361_vm7 = vcmp.eq.s32.totalorder %v1360_v28, 1 }
 0x2dd   :  { %v1751_v47 = vpop.eup %1750 }
 0x2de   :  { %v1119_v18 = vmul.f32 %v1751_v47, %v1112_v31 }
 0x2e0   :  { %v3051_v44 = vsel %vm1130_vm9, %v1119_v18, %v2969_v43  ;;  %1219 = vmatmul.f32.vlgmr.msrb.gmra.mxu0 %v1119_v18  ;;  %1239 = vmatmul.f32.vlgmr.msrb.gmra.mxu1 %v1119_v18 }
 0x2e1   :  { %1259 = vmatmul.f32.vlgmr.msrb.gmra.mxu2 %v1119_v18  ;;  %1279 = vmatmul.f32.vlgmr.msrb.gmra.mxu3 %v1119_v18  ;;  %v3197_v18 = vld [vmem:[#allocation17_spill] sm:$0xff] }
 0x35d   :  { %v1220_v25 = vpop.f32.mrf.mxu0  ;;  %v1240_v53 = vpop.f32.mrf.mxu1 }
 0x35e   :  { %v1283_v57 = vadd.f32 %v1220_v25, %v3193_v45  ;;  %v1284_v0 = vadd.f32 %v1240_v53, %v3194_v59  ;;  %v3198_v53 = vld [vmem:[#allocation18_spill] sm:$0xff] }
 0x360   :  { %v1667_v41 = vmul.f32 -1.442695, %v1283_v57  ;;  %v1668_v3 = vmul.f32 -1.442695, %v1284_v0 }
 0x362   :  { %1752 = vpow2.f32 %v1667_v41  ;;  %v3199_v41 = vld [vmem:[#allocation20_spill] sm:$0xff] }
 0x363   :  { %1754 = vpow2.f32 %v1668_v3 }
 0x364   :  { %v1280_v37 = vpop.f32.mrf.mxu3  ;;  %v1260_v1 = vpop.f32.mrf.mxu2 }
 0x365   :  { %v1286_v55 = vadd.f32 %v1280_v37, %v3195_v50  ;;  %v1285_v5 = vadd.f32 %v1260_v1, %v3196_v7  ;;  %v3200_v1 = vld [vmem:[#allocation19_spill] sm:$0xff] }
 0x367   :  { %v1669_v58 = vmul.f32 -1.442695, %v1286_v55 }
 0x368   :  { %v1753_v43 = vpop.eup %1752 }
 0x369   :  { %v1755_v16 = vpop.eup %1754  ;;  %v1290_v60 = vadd.f32 1.0, %v1753_v43  ;;  %1756 = vpow2.f32 %v1669_v58 }
 0x36a   :  { %v1309_v62 = vadd.f32 1.0, %v1755_v16 }
 0x36b   :  { %1758 = vrcp.f32 %v1290_v60  ;;  %v1302_v29 = vand.u32 2147483648, %v1290_v60  ;;  %v1300_v4 = vand.u32 2147483647, %v1290_v60  ;;  %vm1296_vm13 = vweird.f32 %v1290_v60 }
 0x36c   :  { %1760 = vrcp.f32 %v1309_v62  ;;  %v1321_v10 = vand.u32 2147483648, %v1309_v62  ;;  %v1319_v12 = vand.u32 2147483647, %v1309_v62  ;;  %vm1315_vm14 = vweird.f32 %v1309_v62 }
 0x36d   :  { %v1303_v33 = vor.u32 1.1754944e-38, %v1302_v29  ;;  %vm1301_vm1 = vcmp.eq.f32.partialorder %v1300_v4, 8.507059e+37 }
 0x36e   :  { %v1322_v9 = vor.u32 1.1754944e-38, %v1321_v10  ;;  %vm1320_vm2 = vcmp.eq.f32.partialorder %v1319_v12, 8.507059e+37 }
 0x36f   :  { %v1757_v11 = vpop.eup %1756 }
 0x370   :  { %v1329_v40 = vadd.f32 1.0, %v1757_v11 }
 0x371   :  { %v1759_v63 = vpop.eup %1758 }
 0x372   :  { %v1761_v14 = vpop.eup %1760  ;;  %v1292_v17 = vmul.f32 %v1759_v63, %v1290_v60  ;;  %1762 = vrcp.f32 %v1329_v40  ;;  %vm1297_vm11 = vweird.f32 %v1759_v63  ;;  %v1341_v54 = vand.u32 2147483648, %v1329_v40 }
 0x373   :  { %v1311_v21 = vmul.f32 %v1761_v14, %v1309_v62  ;;  %1764 = vtanh.f32 %v1285_v5  ;;  %vm1316_vm12 = vweird.f32 %v1761_v14  ;;  %vm1298_vm15 = vmor %vm1296_vm13, %vm1297_vm11  ;;  %vm1335_vm4 = vweird.f32 %v1329_v40 }
 0x374   :  { %v1293_v26 = vsub.f32 1.0, %v1292_v17  ;;  %vm1317_vm0 = vmor %vm1315_vm14, %vm1316_vm12  ;;  %v1339_v61 = vand.u32 2147483647, %v1329_v40  ;;  %v1342_v8 = vor.u32 1.1754944e-38, %v1341_v54  ;;  %v1591_v54 = vpop.permute.xlu2 %1590 }
 0x375   :  { %v1312_v27 = vsub.f32 1.0, %v1311_v21 }
 0x376   :  { %v1294_v35 = vmul.f32 %v1759_v63, %v1293_v26  ;;  %vm1340_vm6 = vcmp.eq.f32.partialorder %v1339_v61, 8.507059e+37 }
 0x377   :  { %v1313_v32 = vmul.f32 %v1761_v14, %v1312_v27 }
 0x378   :  { %v1763_v34 = vpop.eup %1762  ;;  %v1295_v30 = vadd.f32 %v1759_v63, %v1294_v35 }
 0x379   :  { %v1314_v39 = vadd.f32 %v1761_v14, %v1313_v32  ;;  %v1331_v23 = vmul.f32 %v1763_v34, %v1329_v40  ;;  %v1765_v49 = vpop.eup %1764  ;;  %vm1336_vm3 = vweird.f32 %v1763_v34 }
 0x37a   :  { %v1299_v38 = vsel %vm1298_vm15, %v1759_v63, %v1295_v30  ;;  %vm1337_vm5 = vmor %vm1335_vm4, %vm1336_vm3  ;;  %vm1592_vm4 = vcmp.eq.s32.totalorder %v1591_v54, 1 }
 0x37b   :  { %v1304_v20 = vsel %vm1301_vm1, %v1303_v33, %v1299_v38  ;;  %v1318_v13 = vsel %vm1317_vm0, %v1761_v14, %v1314_v39  ;;  %v1332_v36 = vsub.f32 1.0, %v1331_v23 }
 0x37c   :  { %v1323_v51 = vsel %vm1320_vm2, %v1322_v9, %v1318_v13  ;;  %v1347_v42 = vmul.f32 %v1765_v49, %v1304_v20 }
 0x37d   :  { %v1346_v52 = vmul.f32 %v1323_v51, %v3047_v19  ;;  %v1333_v56 = vmul.f32 %v1763_v34, %v1332_v36 }
 0x37f   :  { %v3060_v48 = vadd.f32 %v1347_v42, %v1346_v52  ;;  %v1334_v24 = vadd.f32 %v1763_v34, %v1333_v56 }
 0x381   :  { %1766 = vtanh.f32 %v3060_v48  ;;  %v1338_v6 = vsel %vm1337_vm5, %v1763_v34, %v1334_v24 }
 0x382   :  { %v1343_v15 = vsel %vm1340_vm6, %v1342_v8, %v1338_v6 }
 0x387   :  { %v1767_v22 = vpop.eup %1766 }
 0x388   :  { %v1350_v46 = vmul.f32 %v1767_v22, %v1343_v15 }
 0x38a   :  { %v3064_v19 = vsel %vm1361_vm7, %v1350_v46, %v3051_v44  ;;  %1450 = vmatmul.f32.vlgmr.msra.gmra.mxu0 %v1350_v46  ;;  %1470 = vmatmul.f32.vlgmr.msra.gmra.mxu1 %v1350_v46 }
 0x38b   :  { %1490 = vmatmul.f32.vlgmr.msra.gmra.mxu2 %v1350_v46  ;;  %1510 = vmatmul.f32.vlgmr.msra.gmra.mxu3 %v1350_v46 }
 0x407   :  { %v1451_v47 = vpop.f32.mrf.mxu0  ;;  %v1471_v31 = vpop.f32.mrf.mxu1 }
 0x408   :  { %v1514_v25 = vadd.f32 %v1451_v47, %v3197_v18  ;;  %v1515_v45 = vadd.f32 %v1471_v31, %v3198_v53 }
 0x40a   :  { %v1671_v57 = vmul.f32 -1.442695, %v1514_v25  ;;  %v1672_v59 = vmul.f32 -1.442695, %v1515_v45 }
 0x40c   :  { %1768 = vpow2.f32 %v1671_v57 }
 0x40d   :  { %1770 = vpow2.f32 %v1672_v59 }
 0x40e   :  { %v1511_v0 = vpop.f32.mrf.mxu3  ;;  %v1491_v43 = vpop.f32.mrf.mxu2 }
 0x40f   :  { %v1517_v3 = vadd.f32 %v1511_v0, %v3199_v41  ;;  %v1516_v2 = vadd.f32 %v1491_v43, %v3200_v1 }
 0x411   :  { %v1673_v37 = vmul.f32 -1.442695, %v1517_v3 }
 0x412   :  { %v1769_v44 = vpop.eup %1768 }
 0x413   :  { %v1771_v50 = vpop.eup %1770  ;;  %v1521_v55 = vadd.f32 1.0, %v1769_v44  ;;  %1772 = vpow2.f32 %v1673_v37 }
 0x414   :  { %v1540_v58 = vadd.f32 1.0, %v1771_v50 }
 0x415   :  { %1774 = vrcp.f32 %v1521_v55  ;;  %v1533_v14 = vand.u32 2147483648, %v1521_v55  ;;  %v1531_v26 = vand.u32 2147483647, %v1521_v55  ;;  %vm1527_vm10 = vweird.f32 %v1521_v55 }
 0x416   :  { %1776 = vrcp.f32 %v1540_v58  ;;  %v1552_v17 = vand.u32 2147483648, %v1540_v58  ;;  %v1550_v29 = vand.u32 2147483647, %v1540_v58  ;;  %vm1546_vm11 = vweird.f32 %v1540_v58 }
 0x417   :  { %v1534_v4 = vor.u32 1.1754944e-38, %v1533_v14  ;;  %vm1532_vm14 = vcmp.eq.f32.partialorder %v1531_v26, 8.507059e+37 }
 0x418   :  { %v1553_v34 = vor.u32 1.1754944e-38, %v1552_v17  ;;  %vm1551_vm15 = vcmp.eq.f32.partialorder %v1550_v29, 8.507059e+37 }
 0x419   :  { %v1773_v16 = vpop.eup %1772 }
 0x41a   :  { %v1560_v60 = vadd.f32 1.0, %v1773_v16 }
 0x41b   :  { %v1775_v62 = vpop.eup %1774 }
 0x41c   :  { %v1777_v11 = vpop.eup %1776  ;;  %v1523_v40 = vmul.f32 %v1775_v62, %v1521_v55  ;;  %1778 = vrcp.f32 %v1560_v60  ;;  %vm1528_vm8 = vweird.f32 %v1775_v62  ;;  %v1572_v42 = vand.u32 2147483648, %v1560_v60 }
 0x41d   :  { %v1542_v63 = vmul.f32 %v1777_v11, %v1540_v58  ;;  %1780 = vtanh.f32 %v1516_v2  ;;  %vm1547_vm9 = vweird.f32 %v1777_v11  ;;  %vm1529_vm12 = vmor %vm1527_vm10, %vm1528_vm8  ;;  %vm1566_vm1 = vweird.f32 %v1560_v60 }
 0x41e   :  { %v1524_v7 = vsub.f32 1.0, %v1523_v40  ;;  %vm1548_vm13 = vmor %vm1546_vm11, %vm1547_vm9  ;;  %v1570_v52 = vand.u32 2147483647, %v1560_v60  ;;  %v1573_v24 = vor.u32 1.1754944e-38, %v1572_v42 }
 0x41f   :  { %v1543_v5 = vsub.f32 1.0, %v1542_v63 }
 0x420   :  { %v1525_v21 = vmul.f32 %v1775_v62, %v1524_v7  ;;  %vm1571_vm3 = vcmp.eq.f32.partialorder %v1570_v52, 8.507059e+37 }
 0x421   :  { %v1544_v27 = vmul.f32 %v1777_v11, %v1543_v5 }
 0x422   :  { %v1779_v10 = vpop.eup %1778  ;;  %v1526_v35 = vadd.f32 %v1775_v62, %v1525_v21 }
 0x423   :  { %v1545_v32 = vadd.f32 %v1777_v11, %v1544_v27  ;;  %v1562_v12 = vmul.f32 %v1779_v10, %v1560_v60  ;;  %v1781_v33 = vpop.eup %1780  ;;  %vm1567_vm0 = vweird.f32 %v1779_v10 }
 0x424   :  { %v1530_v30 = vsel %vm1529_vm12, %v1775_v62, %v1526_v35  ;;  %vm1568_vm2 = vmor %vm1566_vm1, %vm1567_vm0 }
 0x425   :  { %v1535_v39 = vsel %vm1532_vm14, %v1534_v4, %v1530_v30  ;;  %v1549_v23 = vsel %vm1548_vm13, %v1777_v11, %v1545_v32  ;;  %v1563_v9 = vsub.f32 1.0, %v1562_v12 }
 0x426   :  { %v1554_v38 = vsel %vm1551_vm15, %v1553_v34, %v1549_v23  ;;  %v1578_v49 = vmul.f32 %v1781_v33, %v1535_v39 }
 0x427   :  { %v1577_v20 = vmul.f32 %v1554_v38, %v3060_v48  ;;  %v1564_v13 = vmul.f32 %v1779_v10, %v1563_v9 }
 0x429   :  { %v1579_v36 = vadd.f32 %v1578_v49, %v1577_v20  ;;  %v1565_v51 = vadd.f32 %v1779_v10, %v1564_v13 }
 0x42b   :  { %1782 = vtanh.f32 %v1579_v36  ;;  %v1569_v56 = vsel %vm1568_vm2, %v1779_v10, %v1565_v51 }
 0x42c   :  { %v1574_v61 = vsel %vm1571_vm3, %v1573_v24, %v1569_v56 }
 0x431   :  { %v1783_v48 = vpop.eup %1782 }
 0x432   :  { %v1581_v28 = vmul.f32 %v1783_v48, %v1574_v61 }
 0x434   :  { %v1593_v6 = vsel %vm1592_vm4, %v1581_v28, %v3064_v19 }
 0x435   :  { %1594 = vst [vmem:[#allocation5] sm:$0xff] %v1593_v6 }
 0x436   :  { %1605 = dma.vmem_to_hbm [thread:$0]  %s1601_s4, 128, %s1603_s8, [#allocation6]  }
 0x437   :  { %1808 = dma.done.wait [#allocation6], 128  }
 0x438   :  { %1809 = vsyncadd [#allocation6], 4294967168 }
 0x439   :  { %1610 = vsyncpa [#allocation6], 1 }

</bundles_post_ra>
